<compile_context>
chip_gen: v5e
topology: v5e:2x2
jax: 0.10.0
libtpu: 0.0.40
codegen_flags: <defaults>
</compile_context>

<pallas_src>
import jax
import jax.numpy as jnp
from jax.experimental import pallas as pl
from jax.experimental.pallas import tpu as pltpu

HIDDEN_SIZE = 256


def _critic_kernel(x_ref, w2_ref, wfc_ref, c_ref, out_ref, p2_scr, h2f_scr):
    # Packed constants layout (c_ref, (8, 256) f32):
    #   row 0: fc1 bias (256)            row 1: fc2 bias (256)
    #   row 2: critic_out weight (256)   row 3: [b1 (0:32) | b2 (32:96) | bo (96)]
    #   rows 4..6: conv1 weight, row kh, col = kw*32 + cout        row 7: unused pad
    x = x_ref[...]                                               # (6, 7)

    # ---- conv1 (1 -> 32, 3x3 VALID) + ReLU, kept in vregs, HWC (4,5,32) ----
    acc1 = jnp.zeros((4, 5, 32), jnp.float32)
    for kh in range(3):
        for kw in range(3):
            patch = x[kh:kh + 4, kw:kw + 5]                      # (4, 5)
            wvec = c_ref[4 + kh, kw * 32:(kw + 1) * 32]          # (32,)
            acc1 = acc1 + patch[:, :, None] * wvec[None, None, :]
    b1 = c_ref[3, 0:32]                                          # (32,)
    h1 = jnp.maximum(acc1 + b1[None, None, :], 0.0)              # (4, 5, 32)

    # ---- im2col for conv2: scratch (6, 288), rows p = oh*3+ow, cols (kh*3+kw)*32+cin ----
    for kh in range(3):
        for kw in range(3):
            j = kh * 3 + kw
            for oh in range(2):
                p2_scr[oh * 3:(oh + 1) * 3, j * 32:(j + 1) * 32] = h1[kh + oh, kw:kw + 3, :]

    # ---- conv2 (32 -> 64) + ReLU as ONE MXU dot ----
    b2 = c_ref[3:4, 32:96]                                       # (1, 64)
    h2 = jnp.maximum(
        jnp.dot(p2_scr[...], w2_ref[...], preferred_element_type=jnp.float32) + b2,
        0.0)                                                     # (6, 64)

    # ---- flatten (p, c) -> (1, 384); fc1 weight was pre-permuted to this order ----
    for p in range(6):
        h2f_scr[0:1, p * 64:(p + 1) * 64] = h2[p:p + 1, :]

    # ---- fc1 + tanh: ONE (1,384)@(384,256) dot ----
    h3 = jnp.tanh(
        jnp.dot(h2f_scr[...], wfc_ref[0:384, :], preferred_element_type=jnp.float32)
        + c_ref[0:1, :])                                         # (1, 256)

    # ---- fc2 + tanh ----
    h4 = jnp.tanh(
        jnp.dot(h3, wfc_ref[384:640, :], preferred_element_type=jnp.float32)
        + c_ref[1:2, :])                                         # (1, 256)

    # ---- critic_out_layer (256 -> 1) as VPU multiply + lane reduction ----
    out_ref[...] = jnp.sum(h4 * c_ref[2:3, :], axis=1, keepdims=True) + c_ref[3:4, 96:97]


def prepare_params(params):
    """One-time re-layout/packing of PyTorch-format params into kernel inputs.
    Call once and reuse the result across forward calls (hoisted off the hot path)."""
    (w1, b1, w2, b2, wf1, bf1, wf2, bf2, wo, bo) = [jnp.asarray(p, jnp.float32) for p in params]
    # conv2 weight (cout=64, cin=32, kh, kw) -> rows (kh*3+kw)*32+cin, cols cout.
    w2_k = jnp.transpose(w2, (2, 3, 1, 0)).reshape(288, 64)
    # fc1 weight (256, 384); 384 indexed as c*6 + p (PyTorch CHW flatten, p = h*3+w)
    #   -> rows p*64 + c, cols out, matching the kernel's row-major (p, c) flatten.
    wf1_k = jnp.transpose(wf1.reshape(HIDDEN_SIZE, 64, 6), (2, 1, 0)).reshape(384, HIDDEN_SIZE)
    wfc = jnp.concatenate([wf1_k, wf2.T], axis=0)                # (640, 256)
    # Packed small constants (+ conv1 weights).
    w1_rows = jnp.transpose(w1[:, 0], (1, 2, 0)).reshape(3, 96)  # [kh, kw*32 + cout]
    consts = jnp.zeros((8, 256), jnp.float32)
    consts = consts.at[0, :].set(bf1)
    consts = consts.at[1, :].set(bf2)
    consts = consts.at[2, :].set(wo.reshape(256))
    consts = consts.at[3, 0:32].set(b1)
    consts = consts.at[3, 32:96].set(b2)
    consts = consts.at[3, 96:97].set(bo)
    consts = consts.at[4:7, 0:96].set(w1_rows)
    return w2_k, wfc, consts


@jax.jit
def conv_critic_forward(x_nchw, kernel_params):
    w2_k, wfc, consts = kernel_params
    x2d = x_nchw.reshape(6, 7).astype(jnp.float32)
    out = pl.pallas_call(
        _critic_kernel,
        out_shape=jax.ShapeDtypeStruct((1, 1), jnp.float32),
        in_specs=[pl.BlockSpec(memory_space=pltpu.MemorySpace.VMEM)] * 4,
        out_specs=pl.BlockSpec(memory_space=pltpu.MemorySpace.VMEM),
        scratch_shapes=[pltpu.VMEM((6, 288), jnp.float32),
                        pltpu.VMEM((1, 384), jnp.float32)],
    )(x2d, w2_k, wfc, consts)
    # PyTorch: Flatten(start_dim=0) then Linear(256, 1) -> output shape (1,)
    return out.reshape(1)


def _reference_forward(x_nchw, params):
    """Pure-JAX mirror of the PyTorch forward (NCHW convs, CHW flatten)."""
    (w1, b1, w2, b2, wf1, bf1, wf2, bf2, wo, bo) = params
    dn = ("NCHW", "OIHW", "NCHW")
    y = jax.lax.conv_general_dilated(x_nchw, w1, (1, 1), "VALID", dimension_numbers=dn)
    y = jax.nn.relu(y + b1[None, :, None, None])
    y = jax.lax.conv_general_dilated(y, w2, (1, 1), "VALID", dimension_numbers=dn)
    y = jax.nn.relu(y + b2[None, :, None, None])
    f = y.reshape(-1)                                            # flatten(start_dim=0)
    h = jnp.tanh(wf1 @ f + bf1)
    h = jnp.tanh(wf2 @ h + bf2)
    return wo @ h + bo                                           # shape (1,)


def _init_params(key):
    ks = jax.random.split(key, 10)
    n = jax.random.normal
    return (
        0.10 * n(ks[0], (32, 1, 3, 3), jnp.float32),             # conv1.weight
        0.05 * n(ks[1], (32,), jnp.float32),                     # conv1.bias
        0.05 * n(ks[2], (64, 32, 3, 3), jnp.float32),            # conv2.weight
        0.05 * n(ks[3], (64,), jnp.float32),                     # conv2.bias
        0.05 * n(ks[4], (HIDDEN_SIZE, 384), jnp.float32),        # fc1.weight
        0.05 * n(ks[5], (HIDDEN_SIZE,), jnp.float32),            # fc1.bias
        0.05 * n(ks[6], (HIDDEN_SIZE, HIDDEN_SIZE), jnp.float32),# fc2.weight
        0.05 * n(ks[7], (HIDDEN_SIZE,), jnp.float32),            # fc2.bias
        0.05 * n(ks[8], (1, HIDDEN_SIZE), jnp.float32),          # critic_out.weight
        0.05 * n(ks[9], (1,), jnp.float32),                      # critic_out.bias
    )


if __name__ == "__main__":
    key = jax.random.PRNGKey(0)
    k_x, k_p = jax.random.split(key)
    x = jax.random.normal(k_x, (1, 1, 6, 7), jnp.float32)        # NCHW board input
    params = _init_params(k_p)

    kernel_params = prepare_params(params)                       # hoisted, reuse across calls

    out = conv_critic_forward(x, kernel_params)
    out = jax.block_until_ready(out)

    ref = _reference_forward(x, params)
    assert out.shape == (1,), out.shape
    assert jnp.allclose(out, ref, rtol=1e-4, atol=1e-4), (out, ref)
    print("KERNEL_OK")
</pallas_src>

<mosaic_0001>
module attributes {stable_mosaic.version = 11 : i64} {
  func.func @_critic_kernel(%arg0: memref<6x7xf32, #tpu.memory_space<vmem>>, %arg1: memref<288x64xf32, #tpu.memory_space<vmem>>, %arg2: memref<640x256xf32, #tpu.memory_space<vmem>>, %arg3: memref<8x256xf32, #tpu.memory_space<vmem>>, %arg4: memref<1x1xf32, #tpu.memory_space<vmem>>, %arg5: memref<6x288xf32, #tpu.memory_space<vmem>>, %arg6: memref<1x384xf32, #tpu.memory_space<vmem>>) attributes {dimension_semantics = [], scalar_prefetch = 0 : i64, scratch_operands = 2 : i64, tpu.core_type = #tpu.core_type<tc>} {
    %c0 = arith.constant 0 : index
    %c0_0 = arith.constant 0 : index
    %0 = vector.load %arg0[%c0, %c0_0] : memref<6x7xf32, #tpu.memory_space<vmem>>, vector<6x7xf32>
    %cst = arith.constant 0.000000e+00 : f32
    %1 = vector.broadcast %cst : f32 to vector<4x5x32xf32>
    %2 = vector.extract_strided_slice %0 {offsets = [0, 0], sizes = [4, 5], strides = [1, 1]} : vector<6x7xf32> to vector<4x5xf32>
    %c4 = arith.constant 4 : index
    %c0_1 = arith.constant 0 : index
    %3 = vector.load %arg3[%c4, %c0_1] : memref<8x256xf32, #tpu.memory_space<vmem>>, vector<1x32xf32>
    %4 = vector.shape_cast %3 : vector<1x32xf32> to vector<32xf32>
    %5 = vector.shape_cast %2 : vector<4x5xf32> to vector<4x5x1xf32>
    %6 = vector.shape_cast %4 : vector<32xf32> to vector<1x1x32xf32>
    %7 = vector.broadcast %5 : vector<4x5x1xf32> to vector<4x5x32xf32>
    %8 = vector.broadcast %6 : vector<1x1x32xf32> to vector<4x5x32xf32>
    %9 = arith.mulf %7, %8 : vector<4x5x32xf32>
    %10 = arith.addf %1, %9 : vector<4x5x32xf32>
    %11 = vector.extract_strided_slice %0 {offsets = [0, 1], sizes = [4, 5], strides = [1, 1]} : vector<6x7xf32> to vector<4x5xf32>
    %c4_2 = arith.constant 4 : index
    %c32 = arith.constant 32 : index
    %12 = vector.load %arg3[%c4_2, %c32] : memref<8x256xf32, #tpu.memory_space<vmem>>, vector<1x32xf32>
    %13 = vector.shape_cast %12 : vector<1x32xf32> to vector<32xf32>
    %14 = vector.shape_cast %11 : vector<4x5xf32> to vector<4x5x1xf32>
    %15 = vector.shape_cast %13 : vector<32xf32> to vector<1x1x32xf32>
    %16 = vector.broadcast %14 : vector<4x5x1xf32> to vector<4x5x32xf32>
    %17 = vector.broadcast %15 : vector<1x1x32xf32> to vector<4x5x32xf32>
    %18 = arith.mulf %16, %17 : vector<4x5x32xf32>
    %19 = arith.addf %10, %18 : vector<4x5x32xf32>
    %20 = vector.extract_strided_slice %0 {offsets = [0, 2], sizes = [4, 5], strides = [1, 1]} : vector<6x7xf32> to vector<4x5xf32>
    %c4_3 = arith.constant 4 : index
    %c64 = arith.constant 64 : index
    %21 = vector.load %arg3[%c4_3, %c64] : memref<8x256xf32, #tpu.memory_space<vmem>>, vector<1x32xf32>
    %22 = vector.shape_cast %21 : vector<1x32xf32> to vector<32xf32>
    %23 = vector.shape_cast %20 : vector<4x5xf32> to vector<4x5x1xf32>
    %24 = vector.shape_cast %22 : vector<32xf32> to vector<1x1x32xf32>
    %25 = vector.broadcast %23 : vector<4x5x1xf32> to vector<4x5x32xf32>
    %26 = vector.broadcast %24 : vector<1x1x32xf32> to vector<4x5x32xf32>
    %27 = arith.mulf %25, %26 : vector<4x5x32xf32>
    %28 = arith.addf %19, %27 : vector<4x5x32xf32>
    %29 = vector.extract_strided_slice %0 {offsets = [1, 0], sizes = [4, 5], strides = [1, 1]} : vector<6x7xf32> to vector<4x5xf32>
    %c5 = arith.constant 5 : index
    %c0_4 = arith.constant 0 : index
    %30 = vector.load %arg3[%c5, %c0_4] : memref<8x256xf32, #tpu.memory_space<vmem>>, vector<1x32xf32>
    %31 = vector.shape_cast %30 : vector<1x32xf32> to vector<32xf32>
    %32 = vector.shape_cast %29 : vector<4x5xf32> to vector<4x5x1xf32>
    %33 = vector.shape_cast %31 : vector<32xf32> to vector<1x1x32xf32>
    %34 = vector.broadcast %32 : vector<4x5x1xf32> to vector<4x5x32xf32>
    %35 = vector.broadcast %33 : vector<1x1x32xf32> to vector<4x5x32xf32>
    %36 = arith.mulf %34, %35 : vector<4x5x32xf32>
    %37 = arith.addf %28, %36 : vector<4x5x32xf32>
    %38 = vector.extract_strided_slice %0 {offsets = [1, 1], sizes = [4, 5], strides = [1, 1]} : vector<6x7xf32> to vector<4x5xf32>
    %c5_5 = arith.constant 5 : index
    %c32_6 = arith.constant 32 : index
    %39 = vector.load %arg3[%c5_5, %c32_6] : memref<8x256xf32, #tpu.memory_space<vmem>>, vector<1x32xf32>
    %40 = vector.shape_cast %39 : vector<1x32xf32> to vector<32xf32>
    %41 = vector.shape_cast %38 : vector<4x5xf32> to vector<4x5x1xf32>
    %42 = vector.shape_cast %40 : vector<32xf32> to vector<1x1x32xf32>
    %43 = vector.broadcast %41 : vector<4x5x1xf32> to vector<4x5x32xf32>
    %44 = vector.broadcast %42 : vector<1x1x32xf32> to vector<4x5x32xf32>
    %45 = arith.mulf %43, %44 : vector<4x5x32xf32>
    %46 = arith.addf %37, %45 : vector<4x5x32xf32>
    %47 = vector.extract_strided_slice %0 {offsets = [1, 2], sizes = [4, 5], strides = [1, 1]} : vector<6x7xf32> to vector<4x5xf32>
    %c5_7 = arith.constant 5 : index
    %c64_8 = arith.constant 64 : index
    %48 = vector.load %arg3[%c5_7, %c64_8] : memref<8x256xf32, #tpu.memory_space<vmem>>, vector<1x32xf32>
    %49 = vector.shape_cast %48 : vector<1x32xf32> to vector<32xf32>
    %50 = vector.shape_cast %47 : vector<4x5xf32> to vector<4x5x1xf32>
    %51 = vector.shape_cast %49 : vector<32xf32> to vector<1x1x32xf32>
    %52 = vector.broadcast %50 : vector<4x5x1xf32> to vector<4x5x32xf32>
    %53 = vector.broadcast %51 : vector<1x1x32xf32> to vector<4x5x32xf32>
    %54 = arith.mulf %52, %53 : vector<4x5x32xf32>
    %55 = arith.addf %46, %54 : vector<4x5x32xf32>
    %56 = vector.extract_strided_slice %0 {offsets = [2, 0], sizes = [4, 5], strides = [1, 1]} : vector<6x7xf32> to vector<4x5xf32>
    %c6 = arith.constant 6 : index
    %c0_9 = arith.constant 0 : index
    %57 = vector.load %arg3[%c6, %c0_9] : memref<8x256xf32, #tpu.memory_space<vmem>>, vector<1x32xf32>
    %58 = vector.shape_cast %57 : vector<1x32xf32> to vector<32xf32>
    %59 = vector.shape_cast %56 : vector<4x5xf32> to vector<4x5x1xf32>
    %60 = vector.shape_cast %58 : vector<32xf32> to vector<1x1x32xf32>
    %61 = vector.broadcast %59 : vector<4x5x1xf32> to vector<4x5x32xf32>
    %62 = vector.broadcast %60 : vector<1x1x32xf32> to vector<4x5x32xf32>
    %63 = arith.mulf %61, %62 : vector<4x5x32xf32>
    %64 = arith.addf %55, %63 : vector<4x5x32xf32>
    %65 = vector.extract_strided_slice %0 {offsets = [2, 1], sizes = [4, 5], strides = [1, 1]} : vector<6x7xf32> to vector<4x5xf32>
    %c6_10 = arith.constant 6 : index
    %c32_11 = arith.constant 32 : index
    %66 = vector.load %arg3[%c6_10, %c32_11] : memref<8x256xf32, #tpu.memory_space<vmem>>, vector<1x32xf32>
    %67 = vector.shape_cast %66 : vector<1x32xf32> to vector<32xf32>
    %68 = vector.shape_cast %65 : vector<4x5xf32> to vector<4x5x1xf32>
    %69 = vector.shape_cast %67 : vector<32xf32> to vector<1x1x32xf32>
    %70 = vector.broadcast %68 : vector<4x5x1xf32> to vector<4x5x32xf32>
    %71 = vector.broadcast %69 : vector<1x1x32xf32> to vector<4x5x32xf32>
    %72 = arith.mulf %70, %71 : vector<4x5x32xf32>
    %73 = arith.addf %64, %72 : vector<4x5x32xf32>
    %74 = vector.extract_strided_slice %0 {offsets = [2, 2], sizes = [4, 5], strides = [1, 1]} : vector<6x7xf32> to vector<4x5xf32>
    %c6_12 = arith.constant 6 : index
    %c64_13 = arith.constant 64 : index
    %75 = vector.load %arg3[%c6_12, %c64_13] : memref<8x256xf32, #tpu.memory_space<vmem>>, vector<1x32xf32>
    %76 = vector.shape_cast %75 : vector<1x32xf32> to vector<32xf32>
    %77 = vector.shape_cast %74 : vector<4x5xf32> to vector<4x5x1xf32>
    %78 = vector.shape_cast %76 : vector<32xf32> to vector<1x1x32xf32>
    %79 = vector.broadcast %77 : vector<4x5x1xf32> to vector<4x5x32xf32>
    %80 = vector.broadcast %78 : vector<1x1x32xf32> to vector<4x5x32xf32>
    %81 = arith.mulf %79, %80 : vector<4x5x32xf32>
    %82 = arith.addf %73, %81 : vector<4x5x32xf32>
    %c3 = arith.constant 3 : index
    %c0_14 = arith.constant 0 : index
    %83 = vector.load %arg3[%c3, %c0_14] : memref<8x256xf32, #tpu.memory_space<vmem>>, vector<1x32xf32>
    %84 = vector.shape_cast %83 : vector<1x32xf32> to vector<32xf32>
    %85 = vector.shape_cast %84 : vector<32xf32> to vector<1x1x32xf32>
    %86 = vector.broadcast %85 : vector<1x1x32xf32> to vector<4x5x32xf32>
    %87 = arith.addf %82, %86 : vector<4x5x32xf32>
    %cst_15 = arith.constant 0.000000e+00 : f32
    %88 = vector.broadcast %cst_15 : f32 to vector<4x5x32xf32>
    %89 = arith.maximumf %87, %88 : vector<4x5x32xf32>
    %90 = vector.extract_strided_slice %89 {offsets = [0, 0, 0], sizes = [1, 3, 32], strides = [1, 1, 1]} : vector<4x5x32xf32> to vector<1x3x32xf32>
    %91 = vector.shape_cast %90 : vector<1x3x32xf32> to vector<3x32xf32>
    %c0_16 = arith.constant 0 : index
    %c0_17 = arith.constant 0 : index
    %92 = vector.load %arg5[%c0_16, %c0_17] : memref<6x288xf32, #tpu.memory_space<vmem>>, vector<3x32xf32>
    tpu.vector_store %arg5[%c0_16, %c0_17], %91 {strides = array<i32>} : memref<6x288xf32, #tpu.memory_space<vmem>>, vector<3x32xf32>,
    %93 = vector.extract_strided_slice %89 {offsets = [1, 0, 0], sizes = [1, 3, 32], strides = [1, 1, 1]} : vector<4x5x32xf32> to vector<1x3x32xf32>
    %94 = vector.shape_cast %93 : vector<1x3x32xf32> to vector<3x32xf32>
    %c3_18 = arith.constant 3 : index
    %c0_19 = arith.constant 0 : index
    %95 = vector.load %arg5[%c3_18, %c0_19] : memref<6x288xf32, #tpu.memory_space<vmem>>, vector<3x32xf32>
    tpu.vector_store %arg5[%c3_18, %c0_19], %94 {strides = array<i32>} : memref<6x288xf32, #tpu.memory_space<vmem>>, vector<3x32xf32>,
    %96 = vector.extract_strided_slice %89 {offsets = [0, 1, 0], sizes = [1, 3, 32], strides = [1, 1, 1]} : vector<4x5x32xf32> to vector<1x3x32xf32>
    %97 = vector.shape_cast %96 : vector<1x3x32xf32> to vector<3x32xf32>
    %c0_20 = arith.constant 0 : index
    %c32_21 = arith.constant 32 : index
    %98 = vector.load %arg5[%c0_20, %c32_21] : memref<6x288xf32, #tpu.memory_space<vmem>>, vector<3x32xf32>
    tpu.vector_store %arg5[%c0_20, %c32_21], %97 {strides = array<i32>} : memref<6x288xf32, #tpu.memory_space<vmem>>, vector<3x32xf32>,
    %99 = vector.extract_strided_slice %89 {offsets = [1, 1, 0], sizes = [1, 3, 32], strides = [1, 1, 1]} : vector<4x5x32xf32> to vector<1x3x32xf32>
    %100 = vector.shape_cast %99 : vector<1x3x32xf32> to vector<3x32xf32>
    %c3_22 = arith.constant 3 : index
    %c32_23 = arith.constant 32 : index
    %101 = vector.load %arg5[%c3_22, %c32_23] : memref<6x288xf32, #tpu.memory_space<vmem>>, vector<3x32xf32>
    tpu.vector_store %arg5[%c3_22, %c32_23], %100 {strides = array<i32>} : memref<6x288xf32, #tpu.memory_space<vmem>>, vector<3x32xf32>,
    %102 = vector.extract_strided_slice %89 {offsets = [0, 2, 0], sizes = [1, 3, 32], strides = [1, 1, 1]} : vector<4x5x32xf32> to vector<1x3x32xf32>
    %103 = vector.shape_cast %102 : vector<1x3x32xf32> to vector<3x32xf32>
    %c0_24 = arith.constant 0 : index
    %c64_25 = arith.constant 64 : index
    %104 = vector.load %arg5[%c0_24, %c64_25] : memref<6x288xf32, #tpu.memory_space<vmem>>, vector<3x32xf32>
    tpu.vector_store %arg5[%c0_24, %c64_25], %103 {strides = array<i32>} : memref<6x288xf32, #tpu.memory_space<vmem>>, vector<3x32xf32>,
    %105 = vector.extract_strided_slice %89 {offsets = [1, 2, 0], sizes = [1, 3, 32], strides = [1, 1, 1]} : vector<4x5x32xf32> to vector<1x3x32xf32>
    %106 = vector.shape_cast %105 : vector<1x3x32xf32> to vector<3x32xf32>
    %c3_26 = arith.constant 3 : index
    %c64_27 = arith.constant 64 : index
    %107 = vector.load %arg5[%c3_26, %c64_27] : memref<6x288xf32, #tpu.memory_space<vmem>>, vector<3x32xf32>
    tpu.vector_store %arg5[%c3_26, %c64_27], %106 {strides = array<i32>} : memref<6x288xf32, #tpu.memory_space<vmem>>, vector<3x32xf32>,
    %108 = vector.extract_strided_slice %89 {offsets = [1, 0, 0], sizes = [1, 3, 32], strides = [1, 1, 1]} : vector<4x5x32xf32> to vector<1x3x32xf32>
    %109 = vector.shape_cast %108 : vector<1x3x32xf32> to vector<3x32xf32>
    %c0_28 = arith.constant 0 : index
    %c96 = arith.constant 96 : index
    %110 = vector.load %arg5[%c0_28, %c96] : memref<6x288xf32, #tpu.memory_space<vmem>>, vector<3x32xf32>
    tpu.vector_store %arg5[%c0_28, %c96], %109 {strides = array<i32>} : memref<6x288xf32, #tpu.memory_space<vmem>>, vector<3x32xf32>,
    %111 = vector.extract_strided_slice %89 {offsets = [2, 0, 0], sizes = [1, 3, 32], strides = [1, 1, 1]} : vector<4x5x32xf32> to vector<1x3x32xf32>
    %112 = vector.shape_cast %111 : vector<1x3x32xf32> to vector<3x32xf32>
    %c3_29 = arith.constant 3 : index
    %c96_30 = arith.constant 96 : index
    %113 = vector.load %arg5[%c3_29, %c96_30] : memref<6x288xf32, #tpu.memory_space<vmem>>, vector<3x32xf32>
    tpu.vector_store %arg5[%c3_29, %c96_30], %112 {strides = array<i32>} : memref<6x288xf32, #tpu.memory_space<vmem>>, vector<3x32xf32>,
    %114 = vector.extract_strided_slice %89 {offsets = [1, 1, 0], sizes = [1, 3, 32], strides = [1, 1, 1]} : vector<4x5x32xf32> to vector<1x3x32xf32>
    %115 = vector.shape_cast %114 : vector<1x3x32xf32> to vector<3x32xf32>
    %c0_31 = arith.constant 0 : index
    %c128 = arith.constant 128 : index
    %116 = vector.load %arg5[%c0_31, %c128] : memref<6x288xf32, #tpu.memory_space<vmem>>, vector<3x32xf32>
    tpu.vector_store %arg5[%c0_31, %c128], %115 {strides = array<i32>} : memref<6x288xf32, #tpu.memory_space<vmem>>, vector<3x32xf32>,
    %117 = vector.extract_strided_slice %89 {offsets = [2, 1, 0], sizes = [1, 3, 32], strides = [1, 1, 1]} : vector<4x5x32xf32> to vector<1x3x32xf32>
    %118 = vector.shape_cast %117 : vector<1x3x32xf32> to vector<3x32xf32>
    %c3_32 = arith.constant 3 : index
    %c128_33 = arith.constant 128 : index
    %119 = vector.load %arg5[%c3_32, %c128_33] : memref<6x288xf32, #tpu.memory_space<vmem>>, vector<3x32xf32>
    tpu.vector_store %arg5[%c3_32, %c128_33], %118 {strides = array<i32>} : memref<6x288xf32, #tpu.memory_space<vmem>>, vector<3x32xf32>,
    %120 = vector.extract_strided_slice %89 {offsets = [1, 2, 0], sizes = [1, 3, 32], strides = [1, 1, 1]} : vector<4x5x32xf32> to vector<1x3x32xf32>
    %121 = vector.shape_cast %120 : vector<1x3x32xf32> to vector<3x32xf32>
    %c0_34 = arith.constant 0 : index
    %c160 = arith.constant 160 : index
    %122 = vector.load %arg5[%c0_34, %c160] : memref<6x288xf32, #tpu.memory_space<vmem>>, vector<3x32xf32>
    tpu.vector_store %arg5[%c0_34, %c160], %121 {strides = array<i32>} : memref<6x288xf32, #tpu.memory_space<vmem>>, vector<3x32xf32>,
    %123 = vector.extract_strided_slice %89 {offsets = [2, 2, 0], sizes = [1, 3, 32], strides = [1, 1, 1]} : vector<4x5x32xf32> to vector<1x3x32xf32>
    %124 = vector.shape_cast %123 : vector<1x3x32xf32> to vector<3x32xf32>
    %c3_35 = arith.constant 3 : index
    %c160_36 = arith.constant 160 : index
    %125 = vector.load %arg5[%c3_35, %c160_36] : memref<6x288xf32, #tpu.memory_space<vmem>>, vector<3x32xf32>
    tpu.vector_store %arg5[%c3_35, %c160_36], %124 {strides = array<i32>} : memref<6x288xf32, #tpu.memory_space<vmem>>, vector<3x32xf32>,
    %126 = vector.extract_strided_slice %89 {offsets = [2, 0, 0], sizes = [1, 3, 32], strides = [1, 1, 1]} : vector<4x5x32xf32> to vector<1x3x32xf32>
    %127 = vector.shape_cast %126 : vector<1x3x32xf32> to vector<3x32xf32>
    %c0_37 = arith.constant 0 : index
    %c192 = arith.constant 192 : index
    %128 = vector.load %arg5[%c0_37, %c192] : memref<6x288xf32, #tpu.memory_space<vmem>>, vector<3x32xf32>
    tpu.vector_store %arg5[%c0_37, %c192], %127 {strides = array<i32>} : memref<6x288xf32, #tpu.memory_space<vmem>>, vector<3x32xf32>,
    %129 = vector.extract_strided_slice %89 {offsets = [3, 0, 0], sizes = [1, 3, 32], strides = [1, 1, 1]} : vector<4x5x32xf32> to vector<1x3x32xf32>
    %130 = vector.shape_cast %129 : vector<1x3x32xf32> to vector<3x32xf32>
    %c3_38 = arith.constant 3 : index
    %c192_39 = arith.constant 192 : index
    %131 = vector.load %arg5[%c3_38, %c192_39] : memref<6x288xf32, #tpu.memory_space<vmem>>, vector<3x32xf32>
    tpu.vector_store %arg5[%c3_38, %c192_39], %130 {strides = array<i32>} : memref<6x288xf32, #tpu.memory_space<vmem>>, vector<3x32xf32>,
    %132 = vector.extract_strided_slice %89 {offsets = [2, 1, 0], sizes = [1, 3, 32], strides = [1, 1, 1]} : vector<4x5x32xf32> to vector<1x3x32xf32>
    %133 = vector.shape_cast %132 : vector<1x3x32xf32> to vector<3x32xf32>
    %c0_40 = arith.constant 0 : index
    %c224 = arith.constant 224 : index
    %134 = vector.load %arg5[%c0_40, %c224] : memref<6x288xf32, #tpu.memory_space<vmem>>, vector<3x32xf32>
    tpu.vector_store %arg5[%c0_40, %c224], %133 {strides = array<i32>} : memref<6x288xf32, #tpu.memory_space<vmem>>, vector<3x32xf32>,
    %135 = vector.extract_strided_slice %89 {offsets = [3, 1, 0], sizes = [1, 3, 32], strides = [1, 1, 1]} : vector<4x5x32xf32> to vector<1x3x32xf32>
    %136 = vector.shape_cast %135 : vector<1x3x32xf32> to vector<3x32xf32>
    %c3_41 = arith.constant 3 : index
    %c224_42 = arith.constant 224 : index
    %137 = vector.load %arg5[%c3_41, %c224_42] : memref<6x288xf32, #tpu.memory_space<vmem>>, vector<3x32xf32>
    tpu.vector_store %arg5[%c3_41, %c224_42], %136 {strides = array<i32>} : memref<6x288xf32, #tpu.memory_space<vmem>>, vector<3x32xf32>,
    %138 = vector.extract_strided_slice %89 {offsets = [2, 2, 0], sizes = [1, 3, 32], strides = [1, 1, 1]} : vector<4x5x32xf32> to vector<1x3x32xf32>
    %139 = vector.shape_cast %138 : vector<1x3x32xf32> to vector<3x32xf32>
    %c0_43 = arith.constant 0 : index
    %c256 = arith.constant 256 : index
    %140 = vector.load %arg5[%c0_43, %c256] : memref<6x288xf32, #tpu.memory_space<vmem>>, vector<3x32xf32>
    tpu.vector_store %arg5[%c0_43, %c256], %139 {strides = array<i32>} : memref<6x288xf32, #tpu.memory_space<vmem>>, vector<3x32xf32>,
    %141 = vector.extract_strided_slice %89 {offsets = [3, 2, 0], sizes = [1, 3, 32], strides = [1, 1, 1]} : vector<4x5x32xf32> to vector<1x3x32xf32>
    %142 = vector.shape_cast %141 : vector<1x3x32xf32> to vector<3x32xf32>
    %c3_44 = arith.constant 3 : index
    %c256_45 = arith.constant 256 : index
    %143 = vector.load %arg5[%c3_44, %c256_45] : memref<6x288xf32, #tpu.memory_space<vmem>>, vector<3x32xf32>
    tpu.vector_store %arg5[%c3_44, %c256_45], %142 {strides = array<i32>} : memref<6x288xf32, #tpu.memory_space<vmem>>, vector<3x32xf32>,
    %c3_46 = arith.constant 3 : index
    %c32_47 = arith.constant 32 : index
    %144 = vector.load %arg3[%c3_46, %c32_47] : memref<8x256xf32, #tpu.memory_space<vmem>>, vector<1x64xf32>
    %c0_48 = arith.constant 0 : index
    %c0_49 = arith.constant 0 : index
    %145 = vector.load %arg5[%c0_48, %c0_49] : memref<6x288xf32, #tpu.memory_space<vmem>>, vector<6x288xf32>
    %c0_50 = arith.constant 0 : index
    %c0_51 = arith.constant 0 : index
    %146 = vector.load %arg1[%c0_50, %c0_51] : memref<288x64xf32, #tpu.memory_space<vmem>>, vector<288x64xf32>
    %cst_52 = arith.constant dense<0.000000e+00> : vector<6x64xf32>
    %147 = tpu.matmul %145, %146, %cst_52 {dimension_numbers = #tpu.dot_dimension_numbers<[1], [0], [0], [1], [0, 0, 1, 1], [], []>} : vector<6x288xf32>, vector<288x64xf32>, vector<6x64xf32> -> vector<6x64xf32>
    %148 = vector.broadcast %144 : vector<1x64xf32> to vector<6x64xf32>
    %149 = arith.addf %147, %148 : vector<6x64xf32>
    %cst_53 = arith.constant 0.000000e+00 : f32
    %150 = vector.broadcast %cst_53 : f32 to vector<6x64xf32>
    %151 = arith.maximumf %149, %150 : vector<6x64xf32>
    %152 = vector.extract_strided_slice %151 {offsets = [0, 0], sizes = [1, 64], strides = [1, 1]} : vector<6x64xf32> to vector<1x64xf32>
    %c0_54 = arith.constant 0 : index
    %c0_55 = arith.constant 0 : index
    %153 = vector.load %arg6[%c0_54, %c0_55] : memref<1x384xf32, #tpu.memory_space<vmem>>, vector<1x64xf32>
    tpu.vector_store %arg6[%c0_54, %c0_55], %152 {strides = array<i32>} : memref<1x384xf32, #tpu.memory_space<vmem>>, vector<1x64xf32>,
    %154 = vector.extract_strided_slice %151 {offsets = [1, 0], sizes = [1, 64], strides = [1, 1]} : vector<6x64xf32> to vector<1x64xf32>
    %c0_56 = arith.constant 0 : index
    %c64_57 = arith.constant 64 : index
    %155 = vector.load %arg6[%c0_56, %c64_57] : memref<1x384xf32, #tpu.memory_space<vmem>>, vector<1x64xf32>
    tpu.vector_store %arg6[%c0_56, %c64_57], %154 {strides = array<i32>} : memref<1x384xf32, #tpu.memory_space<vmem>>, vector<1x64xf32>,
    %156 = vector.extract_strided_slice %151 {offsets = [2, 0], sizes = [1, 64], strides = [1, 1]} : vector<6x64xf32> to vector<1x64xf32>
    %c0_58 = arith.constant 0 : index
    %c128_59 = arith.constant 128 : index
    %157 = vector.load %arg6[%c0_58, %c128_59] : memref<1x384xf32, #tpu.memory_space<vmem>>, vector<1x64xf32>
    tpu.vector_store %arg6[%c0_58, %c128_59], %156 {strides = array<i32>} : memref<1x384xf32, #tpu.memory_space<vmem>>, vector<1x64xf32>,
    %158 = vector.extract_strided_slice %151 {offsets = [3, 0], sizes = [1, 64], strides = [1, 1]} : vector<6x64xf32> to vector<1x64xf32>
    %c0_60 = arith.constant 0 : index
    %c192_61 = arith.constant 192 : index
    %159 = vector.load %arg6[%c0_60, %c192_61] : memref<1x384xf32, #tpu.memory_space<vmem>>, vector<1x64xf32>
    tpu.vector_store %arg6[%c0_60, %c192_61], %158 {strides = array<i32>} : memref<1x384xf32, #tpu.memory_space<vmem>>, vector<1x64xf32>,
    %160 = vector.extract_strided_slice %151 {offsets = [4, 0], sizes = [1, 64], strides = [1, 1]} : vector<6x64xf32> to vector<1x64xf32>
    %c0_62 = arith.constant 0 : index
    %c256_63 = arith.constant 256 : index
    %161 = vector.load %arg6[%c0_62, %c256_63] : memref<1x384xf32, #tpu.memory_space<vmem>>, vector<1x64xf32>
    tpu.vector_store %arg6[%c0_62, %c256_63], %160 {strides = array<i32>} : memref<1x384xf32, #tpu.memory_space<vmem>>, vector<1x64xf32>,
    %162 = vector.extract_strided_slice %151 {offsets = [5, 0], sizes = [1, 64], strides = [1, 1]} : vector<6x64xf32> to vector<1x64xf32>
    %c0_64 = arith.constant 0 : index
    %c320 = arith.constant 320 : index
    %163 = vector.load %arg6[%c0_64, %c320] : memref<1x384xf32, #tpu.memory_space<vmem>>, vector<1x64xf32>
    tpu.vector_store %arg6[%c0_64, %c320], %162 {strides = array<i32>} : memref<1x384xf32, #tpu.memory_space<vmem>>, vector<1x64xf32>,
    %c0_65 = arith.constant 0 : index
    %c0_66 = arith.constant 0 : index
    %164 = vector.load %arg6[%c0_65, %c0_66] : memref<1x384xf32, #tpu.memory_space<vmem>>, vector<1x384xf32>
    %c0_67 = arith.constant 0 : index
    %c0_68 = arith.constant 0 : index
    %165 = vector.load %arg2[%c0_67, %c0_68] : memref<640x256xf32, #tpu.memory_space<vmem>>, vector<384x256xf32>
    %cst_69 = arith.constant dense<0.000000e+00> : vector<1x256xf32>
    %166 = tpu.matmul %164, %165, %cst_69 {dimension_numbers = #tpu.dot_dimension_numbers<[1], [0], [0], [1], [0, 0, 1, 1], [], []>} : vector<1x384xf32>, vector<384x256xf32>, vector<1x256xf32> -> vector<1x256xf32>
    %c0_70 = arith.constant 0 : index
    %c0_71 = arith.constant 0 : index
    %167 = vector.load %arg3[%c0_70, %c0_71] : memref<8x256xf32, #tpu.memory_space<vmem>>, vector<1x256xf32>
    %168 = arith.addf %166, %167 : vector<1x256xf32>
    %169 = math.tanh %168 : vector<1x256xf32>
    %c384 = arith.constant 384 : index
    %c0_72 = arith.constant 0 : index
    %170 = vector.load %arg2[%c384, %c0_72] : memref<640x256xf32, #tpu.memory_space<vmem>>, vector<256x256xf32>
    %cst_73 = arith.constant dense<0.000000e+00> : vector<1x256xf32>
    %171 = tpu.matmul %169, %170, %cst_73 {dimension_numbers = #tpu.dot_dimension_numbers<[1], [0], [0], [1], [0, 0, 1, 1], [], []>} : vector<1x256xf32>, vector<256x256xf32>, vector<1x256xf32> -> vector<1x256xf32>
    %c1 = arith.constant 1 : index
    %c0_74 = arith.constant 0 : index
    %172 = vector.load %arg3[%c1, %c0_74] : memref<8x256xf32, #tpu.memory_space<vmem>>, vector<1x256xf32>
    %173 = arith.addf %171, %172 : vector<1x256xf32>
    %174 = math.tanh %173 : vector<1x256xf32>
    %c2 = arith.constant 2 : index
    %c0_75 = arith.constant 0 : index
    %175 = vector.load %arg3[%c2, %c0_75] : memref<8x256xf32, #tpu.memory_space<vmem>>, vector<1x256xf32>
    %176 = arith.mulf %174, %175 : vector<1x256xf32>
    %cst_76 = arith.constant dense<0.000000e+00> : vector<1xf32>
    %177 = vector.multi_reduction <add>, %176, %cst_76 [1] : vector<1x256xf32> to vector<1xf32>
    %178 = vector.shape_cast %177 : vector<1xf32> to vector<1x1xf32>
    %c3_77 = arith.constant 3 : index
    %c96_78 = arith.constant 96 : index
    %179 = vector.load %arg3[%c3_77, %c96_78] : memref<8x256xf32, #tpu.memory_space<vmem>>, vector<1x1xf32>
    %180 = arith.addf %178, %179 : vector<1x1xf32>
    %c0_79 = arith.constant 0 : index
    %c0_80 = arith.constant 0 : index
    %181 = vector.load %arg4[%c0_79, %c0_80] : memref<1x1xf32, #tpu.memory_space<vmem>>, vector<1x1xf32>
    tpu.vector_store %arg4[%c0_79, %c0_80], %180 {strides = array<i32>} : memref<1x1xf32, #tpu.memory_space<vmem>>, vector<1x1xf32>,
    return
  }
}

</mosaic_0001>

<bundles_post_ra>
// kernel: conv_critic_forward.1
= control target key start
LH: loop header
LB: loop body
LE: loop exit
PB: predicated region body
PF: predicated region fallthrough
CT: control target
= control target key end

     0   :  { %9 = vsyncpa [#allocation5], 0  ;;  %s1374_s0 = inlined_call_operand.vmem [shape: f32[6,7], index: 0, kind: input, shape index: {}]   ;;  %s1375_s1 = inlined_call_operand.vmem [shape: f32[288,64], index: 1, kind: input, shape index: {}]   ;;  %s1376_s2 = inlined_call_operand.hbm [shape: f32[640,256], index: 2, kind: input, shape index: {}]   ;;  %s1377_s3 = inlined_call_operand.vmem [shape: f32[8,256], index: 3, kind: input, shape index: {}]   ;;  %s1378_s4 = inlined_call_operand.hbm [shape: f32[1,1], index: 4, kind: output, shape index: {}]  }
   0x1   :  { %10 = vsyncpa [#allocation6], 0  ;;  %s19_s17 = sshll.u32 %s1376_s2, 4  ;;  %s1069_s18 = smov [#allocation4]   ;;  %s20_s17 = int_to_ptr.hbm [resolvable:$true] %s19_s17 }
   0x2   :  { %s21_s19 = sshll.u32 %s1069_s18, 4  ;;  %s1070_s20 = smov 256   ;;  %s22_s19 = int_to_ptr.vmem [resolvable:$true] %s21_s19 }
   0x3   :  { %s1071_s21 = smov 16  }
   0x4   :  { %27 = dma.hbm_to_vmem [thread:$0]  %s20_s17, 20480, %s22_s19, [#allocation5], %s1070_s20, %s1070_s20, %s1071_s21  }
   0x5   :  { %1065 = dma.done.wait [#allocation5], 20480  }
   0x6   :  { %1066 = vsyncadd [#allocation5], 4294946816  ;;  %v37_v0 = vlaneseq  ;;  %v34_v4 = vld [vmem:[%s1374_s0] sm:$0x3f]  ;;  %s1072_s24 = smov 96   ;;  %s1073_s25 = smov 64  }
   0x7   :  { %v50_v5 = vperm.slane %v34_v4, 2  ;;  %v36_v6 = vperm.slane %v34_v4, 0  ;;  %v43_v7 = vperm.slane %v34_v4, 1  ;;  %v57_v8 = vperm.slane %v34_v4, 3  ;;  %v1111_v11 = vld [vmem:[%s1377_s3 + $0x4] ss:$0 sm:$0xff] }
   0x8   :  { %v38_v1 = vshrl.u32 %v37_v0, 7  ;;  %v169_v9 = vperm.slane %v34_v4, 4  ;;  %v245_v10 = vperm.slane %v34_v4, 5  ;;  %v1132_v28 = vld [vmem:[%s1377_s3 + $0x5] ss:$0 sm:$0xff]  ;;  %vm329_vm0 = vcmask 256000  }
   0x9   :  { %v1149_v37 = vld [vmem:[%s1377_s3 + $0x6] ss:$0 sm:$0xff]  ;;  %vm334_vm1 = vcmask 259075   ;;  %s1074_s14 = smov 32   ;;  %vm459_vm2 = vcmask 261120   ;;  %vm341_vm3 = vcmask 518400  }
   0xa   :  { %v74_v2 = vadd.s32 1, %v38_v1  ;;  %v122_v3 = vadd.s32 2, %v38_v1  ;;  %vm353_vm4 = vcmask 780800   ;;  %vm347_vm5 = vcmask 521475   ;;  %s1075_s6 = smov [#allocation7]   ;;  %s979_s10 = sshll.u32 %s1378_s4, 4  ;;  %s980_s10 = int_to_ptr.hbm [resolvable:$true] %s979_s10 }
   0xb   :  { %vm359_vm6 = vcmask 783875   ;;  %vm364_vm7 = vcmask 1043200   ;;  %vm371_vm8 = vcmask 1046275   ;;  %vm1327_vm9 = vcmp.lt.s32.totalorder %v37_v0, 64  ;;  %s977_s7 = sshll.u32 %s1075_s6, 4  ;;  %s978_s7 = int_to_ptr.vmem [resolvable:$true] %s977_s7 }
   0xc   :  { %1000 = vset.pattern.permute.xlu1 %v74_v2  ;;  %999 = vset.pattern.permute.xlu0 %v74_v2  ;;  %vm536_vm10 = vcmp.ge.s32.totalorder %v37_v0, 64  ;;  %vm537_vm11 = vcmp.lt.s32.totalorder %v37_v0, 128  ;;  %v598_v0 = vld [vmem:[#allocation4 + $0x108] sm:$0xff]  ;;  %vm958_vm13 = vcmask 1040384   ;;  %vm970_vm14 = vcmask 0  }
   0xd   :  { %1002 = vset.pattern.permute.xlu2 %v122_v3  ;;  %vm1348_vm12 = vmand %vm536_vm10, %vm537_vm11 }
  0x14   :  { %88 = vperm.xlu1 %1000, %v50_v5   ;;  %76 = vperm.xlu0 %999, %v36_v6  }
  0x15   :  { %130 = vperm.xlu2 %1002, %v43_v7  }
  0x1c   :  { %1001 = vset.pattern.permute.xlu1 %v122_v3  ;;  %82 = vperm.xlu0 %999, %v43_v7  }
  0x1d   :  { %1003 = vset.pattern.permute.xlu2 %v74_v2 }
  0x24   :  { %124 = vperm.xlu1 %1001, %v36_v6   ;;  %1004 = vset.pattern.permute.xlu0 %v122_v3 }
  0x25   :  { %94 = vperm.xlu2 %1003, %v57_v8  }
  0x2c   :  { %142 = vperm.xlu1 %1001, %v57_v8   ;;  %136 = vperm.xlu0 %1004, %v50_v5  }
  0x2d   :  { %188 = vperm.xlu2 %1003, %v169_v9  }
  0x34   :  { %218 = vperm.xlu1 %1001, %v169_v9   ;;  %294 = vperm.xlu0 %1004, %v245_v10  }
  0x35   :  { %264 = vperm.xlu2 %1003, %v245_v10  }
  0x3c   :  { %1005 = vset.pattern.permute.xlu1 %v38_v1  ;;  %1007 = vset.pattern.permute.xlu0 %v38_v1 }
  0x3d   :  { %1006 = vset.pattern.permute.xlu2 %v38_v1 }
  0x44   :  { %41 = vperm.xlu1 %1005, %v36_v6   ;;  %55 = vperm.xlu0 %1007, %v50_v5  }
  0x45   :  { %48 = vperm.xlu2 %1006, %v43_v7  }
  0x4c   :  { %62 = vperm.xlu1 %1005, %v57_v8   ;;  %1008 = vset.pattern.permute.xlu0 %v122_v3 }
  0x4d   :  { %174 = vperm.xlu2 %1006, %v169_v9  }
  0x55   :  { %250 = vperm.xlu2 %1006, %v245_v10  }
  0x6f   :  { %v131_v14 = vpop.permute.xlu2 %130 }
  0x70   :  { %v145_v15 = vmul.f32 %v131_v14, %v1111_v11  ;;  %v220_v34 = vmul.f32 %v1132_v28, %v131_v14 }
  0x7f   :  { %v95_v22 = vpop.permute.xlu2 %94 }
  0x80   :  { %v99_v25 = vmul.f32 %v95_v22, %v1111_v11  ;;  %v192_v29 = vmul.f32 %v1132_v28, %v95_v22  ;;  %v267_v42 = vmul.f32 %v1149_v37, %v95_v22 }
  0x86   :  { %v77_v12 = vpop.permute.xlu0 %76  ;;  %v89_v16 = vpop.permute.xlu1 %88 }
  0x87   :  { %v96_v13 = vmul.f32 %v77_v12, %v1111_v11  ;;  %v98_v20 = vmul.f32 %v89_v16, %v1111_v11  ;;  %v191_v30 = vmul.f32 %v1132_v28, %v89_v16  ;;  %v189_v32 = vpop.permute.xlu2 %188  ;;  %v266_v44 = vmul.f32 %v1149_v37, %v89_v16 }
  0x88   :  { %v193_v33 = vmul.f32 %v189_v32, %v1132_v28  ;;  %v268_v38 = vmul.f32 %v1149_v37, %v189_v32 }
  0x89   :  { %104 = vrot.lane.b32.xlu1 %v96_v13, %s1072_s24 }
  0x8e   :  { %v83_v17 = vpop.permute.xlu0 %82 }
  0x8f   :  { %v97_v18 = vmul.f32 %v83_v17, %v1111_v11  ;;  %v190_v31 = vmul.f32 %v1132_v28, %v83_v17  ;;  %v265_v41 = vpop.permute.xlu2 %264 }
  0x90   :  { %v269_v43 = vmul.f32 %v265_v41, %v1149_v37 }
  0x91   :  { %154 = vrot.lane.b32.xlu1 %v145_v15, %s1073_s25  ;;  %106 = vrot.lane.b32.xlu2 %v97_v18, %s1072_s24 }
  0x96   :  { %v125_v19 = vpop.permute.xlu1 %124 }
  0x97   :  { %v144_v21 = vmul.f32 %v125_v19, %v1111_v11  ;;  %v454_v19 = vld [vmem:[%s1375_s1 + $0x118] sm:$0xff] }
  0x98   :  { %515 = vmatpush.msra.mxu2 %v454_v19 }
  0x99   :  { %152 = vrot.lane.b32.xlu0 %v144_v21, %s1073_s25  ;;  %108 = vrot.lane.b32.xlu2 %v98_v20, %s1072_s24  ;;  %v453_v20 = vld [vmem:[%s1375_s1 + $0x110] sm:$0xff] }
  0x9a   :  { %516 = vmatpush.msra.mxu2 %v453_v20 }
  0x9e   :  { %v143_v23 = vpop.permute.xlu1 %142  ;;  %v137_v24 = vpop.permute.xlu0 %136 }
  0x9f   :  { %v147_v26 = vmul.f32 %v143_v23, %v1111_v11  ;;  %v146_v27 = vmul.f32 %v137_v24, %v1111_v11  ;;  %v221_v35 = vmul.f32 %v1132_v28, %v137_v24  ;;  %v222_v39 = vmul.f32 %v1132_v28, %v143_v23  ;;  %v49_v50 = vpop.permute.xlu2 %48 }
  0xa0   :  { %v297_v45 = vmul.f32 %v1149_v37, %v143_v23  ;;  %v296_v46 = vmul.f32 %v1149_v37, %v137_v24  ;;  %v65_v6 = vmul.f32 %v49_v50, %v1111_v11  ;;  %v176_v21 = vmul.f32 %v1132_v28, %v49_v50 }
  0xa1   :  { %158 = vrot.lane.b32.xlu1 %v147_v26, %s1073_s25  ;;  %156 = vrot.lane.b32.xlu0 %v146_v27, %s1073_s25 }
  0xa2   :  { %110 = vrot.lane.b32.xlu2 %v99_v25, %s1072_s24 }
  0xa6   :  { %v219_v36 = vpop.permute.xlu1 %218  ;;  %v295_v47 = vpop.permute.xlu0 %294 }
  0xa7   :  { %v223_v40 = vmul.f32 %v219_v36, %v1132_v28  ;;  %v298_v48 = vmul.f32 %v1149_v37, %v219_v36  ;;  %v299_v49 = vmul.f32 %v295_v47, %v1149_v37  ;;  %v1171_v52 = vpop.permute.xlu2 %174 }
  0xa9   :  { %200 = vrot.lane.b32.xlu1 %v191_v30, %s1072_s24  ;;  %198 = vrot.lane.b32.xlu0 %v190_v31, %s1072_s24 }
  0xaa   :  { %202 = vrot.lane.b32.xlu2 %v192_v29, %s1072_s24  ;;  %v179_v29 = vmul.f32 %v1171_v52, %v1132_v28 }
  0xaf   :  { %v1173_v54 = vpop.permute.xlu2 %250 }
  0xb1   :  { %230 = vrot.lane.b32.xlu1 %v221_v35, %s1073_s25  ;;  %228 = vrot.lane.b32.xlu0 %v220_v34, %s1073_s25 }
  0xb2   :  { %204 = vrot.lane.b32.xlu2 %v193_v33, %s1072_s24  ;;  %v451_v33 = vld [vmem:[%s1375_s1 + $0x100] sm:$0xff] }
  0xb6   :  { %v42_v51 = vpop.permute.xlu1 %41  ;;  %v56_v56 = vpop.permute.xlu0 %55 }
  0xb7   :  { %v64_v7 = vmul.f32 %v42_v51, %v1111_v11  ;;  %v66_v9 = vmul.f32 %v56_v56, %v1111_v11  ;;  %v177_v15 = vmul.f32 %v1132_v28, %v56_v56  ;;  %v252_v41 = vmul.f32 %v1149_v37, %v56_v56  ;;  %v320_v51 = vld [vmem:[%s1377_s3 + $0x3] ss:$0 sm:$0xff] }
  0xb8   :  { %v254_v56 = vmul.f32 %v1149_v37, %v1171_v52 }
  0xb9   :  { %234 = vrot.lane.b32.xlu1 %v223_v40, %s1073_s25  ;;  %232 = vrot.lane.b32.xlu0 %v222_v39, %s1073_s25 }
  0xba   :  { %278 = vrot.lane.b32.xlu2 %v268_v38, %s1072_s24 }
  0xbe   :  { %v63_v53 = vpop.permute.xlu1 %62 }
  0xbf   :  { %v67_v12 = vmul.f32 %v63_v53, %v1111_v11  ;;  %v452_v11 = vld [vmem:[%s1375_s1 + $0x108] sm:$0xff]  ;;  %v178_v30 = vmul.f32 %v1132_v28, %v63_v53 }
  0xc0   :  { %517 = vmatpush.msra.mxu2 %v452_v11 }
  0xc1   :  { %276 = vrot.lane.b32.xlu1 %v267_v42, %s1072_s24  ;;  %274 = vrot.lane.b32.xlu0 %v266_v44, %s1072_s24  ;;  %v253_v42 = vmul.f32 %v1149_v37, %v63_v53  ;;  %v255_v53 = vmul.f32 %v1173_v54, %v1149_v37 }
  0xc2   :  { %280 = vrot.lane.b32.xlu2 %v269_v43, %s1072_s24  ;;  %518 = vmatpush.msra.mxu2 %v451_v33  ;;  %v430_v33 = vld [vmem:[%s1375_s1 + $0x58] sm:$0xff] }
  0xc9   :  { %306 = vrot.lane.b32.xlu1 %v297_v45, %s1073_s25  ;;  %304 = vrot.lane.b32.xlu0 %v296_v46, %s1073_s25 }
  0xd1   :  { %308 = vrot.lane.b32.xlu0 %v298_v48, %s1073_s25  ;;  %310 = vrot.lane.b32.xlu1 %v299_v49, %s1073_s25 }
  0xeb   :  { %v107_v57 = vpop.permute.xlu2 %106 }
  0xec   :  { %v117_v8 = vadd.f32 %v107_v57, %v65_v6 }
  0xf3   :  { %v109_v60 = vpop.permute.xlu2 %108 }
  0xf4   :  { %v118_v22 = vadd.f32 %v109_v60, %v66_v9 }
  0xfb   :  { %v105_v55 = vpop.permute.xlu1 %104 }
  0xfc   :  { %v111_v63 = vpop.permute.xlu2 %110  ;;  %v116_v10 = vadd.f32 %v105_v55, %v64_v7 }
  0xfd   :  { %v119_v23 = vadd.f32 %v111_v63, %v67_v12 }
 0x103   :  { %v155_v58 = vpop.permute.xlu1 %154 }
 0x104   :  { %v203_v3 = vpop.permute.xlu2 %202  ;;  %v165_v16 = vadd.f32 %v155_v58, %v117_v8 }
 0x106   :  { %v181_v26 = vadd.f32 %v177_v15, %v165_v16 }
 0x10b   :  { %v153_v59 = vpop.permute.xlu0 %152 }
 0x10c   :  { %v164_v17 = vadd.f32 %v153_v59, %v116_v10  ;;  %v205_v18 = vpop.permute.xlu2 %204 }
 0x10e   :  { %v180_v27 = vadd.f32 %v176_v21, %v164_v17 }
 0x113   :  { %v159_v61 = vpop.permute.xlu1 %158  ;;  %v157_v62 = vpop.permute.xlu0 %156 }
 0x114   :  { %v167_v24 = vadd.f32 %v159_v61, %v119_v23  ;;  %v166_v25 = vadd.f32 %v157_v62, %v118_v22  ;;  %v279_v43 = vpop.permute.xlu2 %278 }
 0x116   :  { %v183_v36 = vadd.f32 %v179_v29, %v167_v24  ;;  %v182_v38 = vadd.f32 %v178_v30, %v166_v25  ;;  %v433_v29 = vld [vmem:[%s1375_s1 + $0x70] sm:$0xff]  ;;  %v432_v30 = vld [vmem:[%s1375_s1 + $0x68] sm:$0xff] }
 0x118   :  { %v213_v28 = vadd.f32 %v205_v18, %v183_v36  ;;  %v212_v44 = vadd.f32 %v203_v3, %v182_v38  ;;  %v449_v36 = vld [vmem:[%s1375_s1 + $0xf0] sm:$0xff]  ;;  %v428_v38 = vld [vmem:[%s1375_s1 + $0x48] sm:$0xff] }
 0x11b   :  { %v201_v1 = vpop.permute.xlu1 %200  ;;  %v199_v2 = vpop.permute.xlu0 %198 }
 0x11c   :  { %v211_v31 = vadd.f32 %v201_v1, %v181_v26  ;;  %v210_v32 = vadd.f32 %v199_v2, %v180_v27  ;;  %v281_v3 = vpop.permute.xlu2 %280  ;;  %v434_v27 = vld [vmem:[%s1375_s1 + $0x78] sm:$0xff] }
 0x11d   :  { %463 = vmatpush.msra.mxu0 %v434_v27  ;;  %v621_v27 = vld [vmem:[#allocation4 + $0x1c0] sm:$0xff] }
 0x11f   :  { %464 = vmatpush.msra.mxu0 %v433_v29  ;;  %v587_v29 = vld [vmem:[#allocation4 + $0xb0] sm:$0xff] }
 0x121   :  { %465 = vmatpush.msra.mxu0 %v432_v30  ;;  %v619_v30 = vld [vmem:[#allocation4 + $0x1b0] sm:$0xff] }
 0x123   :  { %v231_v4 = vpop.permute.xlu1 %230  ;;  %v229_v5 = vpop.permute.xlu0 %228 }
 0x124   :  { %v241_v39 = vadd.f32 %v231_v4, %v211_v31  ;;  %v240_v40 = vadd.f32 %v229_v5, %v210_v32  ;;  %v431_v31 = vld [vmem:[%s1375_s1 + $0x60] sm:$0xff] }
 0x125   :  { %466 = vmatpush.msra.mxu0 %v431_v31 }
 0x126   :  { %v257_v45 = vadd.f32 %v253_v42, %v241_v39  ;;  %v256_v46 = vadd.f32 %v252_v41, %v240_v40  ;;  %v448_v39 = vld [vmem:[%s1375_s1 + $0xe8] sm:$0xff]  ;;  %v427_v40 = vld [vmem:[%s1375_s1 + $0x40] sm:$0xff] }
 0x127   :  { %467 = vmatpush.msra.mxu0 %v430_v33  ;;  %v447_v41 = vld [vmem:[%s1375_s1 + $0xe0] sm:$0xff] }
 0x128   :  { %v617_v33 = vld [vmem:[#allocation4 + $0x1a0] sm:$0xff] }
 0x12b   :  { %v235_v13 = vpop.permute.xlu1 %234  ;;  %v233_v14 = vpop.permute.xlu0 %232 }
 0x12c   :  { %v243_v47 = vadd.f32 %v235_v13, %v213_v28  ;;  %v242_v48 = vadd.f32 %v233_v14, %v212_v44  ;;  %v446_v28 = vld [vmem:[%s1375_s1 + $0xd8] sm:$0xff]  ;;  %v425_v44 = vld [vmem:[%s1375_s1 + $0x30] sm:$0xff] }
 0x12e   :  { %v259_v60 = vadd.f32 %v255_v53, %v243_v47  ;;  %v258_v61 = vadd.f32 %v254_v56, %v242_v48  ;;  %v444_v47 = vld [vmem:[%s1375_s1 + $0xc8] sm:$0xff]  ;;  %v423_v48 = vld [vmem:[%s1375_s1 + $0x20] sm:$0xff]  ;;  %v441_v56 = vld [vmem:[%s1375_s1 + $0xb0] sm:$0xff] }
 0x12f   :  { %v420_v53 = vld [vmem:[%s1375_s1 + $0x8] sm:$0xff] }
 0x130   :  { %v289_v4 = vadd.f32 %v281_v3, %v259_v60  ;;  %v288_v5 = vadd.f32 %v279_v43, %v258_v61  ;;  %v426_v43 = vld [vmem:[%s1375_s1 + $0x38] sm:$0xff]  ;;  %v439_v60 = vld [vmem:[%s1375_s1 + $0xa0] sm:$0xff] }
 0x133   :  { %v277_v34 = vpop.permute.xlu1 %276  ;;  %v275_v35 = vpop.permute.xlu0 %274 }
 0x134   :  { %v287_v49 = vadd.f32 %v277_v34, %v257_v45  ;;  %v286_v50 = vadd.f32 %v275_v35, %v256_v46  ;;  %v450_v34 = vld [vmem:[%s1375_s1 + $0xf8] sm:$0xff]  ;;  %v429_v35 = vld [vmem:[%s1375_s1 + $0x50] sm:$0xff]  ;;  %v424_v46 = vld [vmem:[%s1375_s1 + $0x28] sm:$0xff] }
 0x135   :  { %483 = vmatpush.msra.mxu1 %v450_v34  ;;  %468 = vmatpush.msra.mxu0 %v429_v35  ;;  %v445_v45 = vld [vmem:[%s1375_s1 + $0xd0] sm:$0xff]  ;;  %v596_v35 = vld [vmem:[#allocation4 + $0xf8] sm:$0xff] }
 0x136   :  { %v659_v34 = vld [vmem:[#allocation4 + $0x2f0] sm:$0xff] }
 0x137   :  { %484 = vmatpush.msra.mxu1 %v449_v36  ;;  %469 = vmatpush.msra.mxu0 %v428_v38  ;;  %v657_v36 = vld [vmem:[#allocation4 + $0x2e0] sm:$0xff]  ;;  %v583_v38 = vld [vmem:[#allocation4 + $0x90] sm:$0xff] }
 0x139   :  { %485 = vmatpush.msra.mxu1 %v448_v39  ;;  %470 = vmatpush.msra.mxu0 %v427_v40  ;;  %v615_v39 = vld [vmem:[#allocation4 + $0x190] sm:$0xff]  ;;  %v594_v40 = vld [vmem:[#allocation4 + $0xe8] sm:$0xff] }
 0x13b   :  { %v307_v55 = vpop.permute.xlu1 %306  ;;  %v305_v57 = vpop.permute.xlu0 %304  ;;  %486 = vmatpush.msra.mxu1 %v447_v41  ;;  %471 = vmatpush.msra.mxu0 %v426_v43  ;;  %v655_v41 = vld [vmem:[#allocation4 + $0x2d0] sm:$0xff]  ;;  %v581_v43 = vld [vmem:[#allocation4 + $0x80] sm:$0xff] }
 0x13c   :  { %v317_v58 = vadd.f32 %v307_v55, %v287_v49  ;;  %v316_v59 = vadd.f32 %v305_v57, %v286_v50  ;;  %v443_v49 = vld [vmem:[%s1375_s1 + $0xc0] sm:$0xff]  ;;  %v442_v55 = vld [vmem:[%s1375_s1 + $0xb8] sm:$0xff]  ;;  %v421_v57 = vld [vmem:[%s1375_s1 + $0x10] sm:$0xff] }
 0x13d   :  { %487 = vmatpush.msra.mxu1 %v446_v28  ;;  %472 = vmatpush.msra.mxu0 %v425_v44  ;;  %v613_v28 = vld [vmem:[#allocation4 + $0x180] sm:$0xff]  ;;  %v579_v44 = vld [vmem:[#allocation4 + $0x70] sm:$0xff] }
 0x13e   :  { %v322_v62 = vadd.f32 %v320_v51, %v317_v58  ;;  %v321_v63 = vadd.f32 %v320_v51, %v316_v59  ;;  %v440_v58 = vld [vmem:[%s1375_s1 + $0xa8] sm:$0xff]  ;;  %v419_v59 = vld [vmem:[%s1375_s1] sm:$0xff] }
 0x13f   :  { %488 = vmatpush.msra.mxu1 %v445_v45  ;;  %473 = vmatpush.msra.mxu0 %v424_v46  ;;  %v611_v45 = vld [vmem:[#allocation4 + $0x170] sm:$0xff] }
 0x140   :  { %v326_v1 = vmax.f32 %v322_v62, 0.0  ;;  %v325_v2 = vmax.f32 %v321_v63, 0.0  ;;  %v438_v62 = vld [vmem:[%s1375_s1 + $0x98] sm:$0xff]  ;;  %v437_v63 = vld [vmem:[%s1375_s1 + $0x90] sm:$0xff] }
 0x141   :  { %489 = vmatpush.msra.mxu1 %v444_v47  ;;  %474 = vmatpush.msra.mxu0 %v423_v48  ;;  %v577_v47 = vld [vmem:[#allocation4 + $0x60] sm:$0xff] }
 0x142   :  { %361 = vrot.lane.b32.xlu0 %v326_v1, %s1072_s24  ;;  %330 = vst.msk [vmem:[#allocation2] sm:$0x7] %vm329_vm0, %v325_v2  ;;  %v337_v52 = vrot.slane %v325_v2, 1  ;;  %v373_v54 = vrot.slane %v326_v1, 1  ;;  %v332_v7 = vrot.slane %v326_v1, 5  ;;  %v343_v15 = vrot.slane %v326_v1, 6 }
 0x143   :  { %v311_v6 = vpop.permute.xlu1 %310  ;;  %v309_v37 = vpop.permute.xlu0 %308  ;;  %v355_v18 = vrot.slane %v326_v1, 7  ;;  %v349_v20 = vrot.slane %v325_v2, 2  ;;  %v379_v22 = vrot.slane %v326_v1, 2  ;;  %490 = vmatpush.msra.mxu1 %v443_v49  ;;  %v436_v1 = vld [vmem:[%s1375_s1 + $0x88] sm:$0xff]  ;;  %v435_v2 = vld [vmem:[%s1375_s1 + $0x80] sm:$0xff]  ;;  %v575_v49 = vld [vmem:[#allocation4 + $0x50] sm:$0xff] }
 0x144   :  { %v319_v8 = vadd.f32 %v311_v6, %v289_v4  ;;  %v318_v9 = vadd.f32 %v309_v37, %v288_v5  ;;  %338 = vrot.lane.b32.xlu2 %v337_v52, %s1074_s14  ;;  %375 = vst.msk [vmem:[#allocation2 + $0x8] sm:$0x7] %vm329_vm0, %v373_v54  ;;  %v609_v48 = vld [vmem:[#allocation4 + $0x160] sm:$0xff] }
 0x145   :  { %335 = vst.msk [vmem:[#allocation2] sm:$0x38] %vm334_vm1, %v332_v7  ;;  %491 = vmatpush.msra.mxu1 %v442_v55  ;;  %v605_v55 = vld [vmem:[#allocation4 + $0x140] sm:$0xff] }
 0x146   :  { %v324_v10 = vadd.f32 %v320_v51, %v319_v8  ;;  %v323_v12 = vadd.f32 %v320_v51, %v318_v9 }
 0x147   :  { %492 = vmatpush.msra.mxu1 %v441_v56  ;;  %v603_v56 = vld [vmem:[#allocation4 + $0x130] sm:$0xff] }
 0x148   :  { %v328_v13 = vmax.f32 %v324_v10, 0.0  ;;  %v327_v14 = vmax.f32 %v323_v12, 0.0 }
 0x149   :  { %493 = vmatpush.msra.mxu1 %v440_v58  ;;  %v569_v58 = vld [vmem:[#allocation4 + $0x20] sm:$0xff] }
 0x14a   :  { %v412_v16 = vrot.slane %v328_v13, 7  ;;  %v409_v17 = vrot.slane %v327_v14, 2  ;;  %344 = vrot.lane.b32.xlu0 %v343_v15, %s1074_s14  ;;  %389 = vrot.lane.b32.xlu1 %v327_v14, %s1073_s25  ;;  %v376_v19 = vrot.slane %v327_v14, 6  ;;  %v384_v21 = vrot.slane %v327_v14, 7 }
 0x14b   :  { %v399_v11 = vrot.slane %v327_v14, 1  ;;  %v367_v24 = vrot.slane %v327_v14, 5  ;;  %v394_v25 = vrot.slane %v328_v13, 5  ;;  %v404_v26 = vrot.slane %v328_v13, 6  ;;  %494 = vmatpush.msra.mxu1 %v439_v60 }
 0x14c   :  { %414 = vst.msk [vmem:[#allocation2 + $0x10] sm:$0x38] %vm334_vm1, %v412_v16  ;;  %356 = vrot.lane.b32.xlu2 %v355_v18, %s1073_s25 }
 0x14d   :  { %411 = vst.msk [vmem:[#allocation2 + $0x10] sm:$0x7] %vm329_vm0, %v409_v17  ;;  %495 = vmatpush.msra.mxu1 %v438_v62  ;;  %v599_v62 = vld [vmem:[#allocation4 + $0x110] sm:$0xff] }
 0x14e   :  { %378 = vst.msk [vmem:[#allocation2 + $0x8] sm:$0x38] %vm334_vm1, %v376_v19  ;;  %v580_v19 = vld [vmem:[#allocation4 + $0x78] sm:$0xff] }
 0x14f   :  { %496 = vmatpush.msra.mxu1 %v437_v63  ;;  %v653_v63 = vld [vmem:[#allocation4 + $0x2c0] sm:$0xff] }
 0x151   :  { %497 = vmatpush.msra.mxu1 %v436_v1  ;;  %v590_v1 = vld [vmem:[#allocation4 + $0xc8] sm:$0xff] }
 0x152   :  { %350 = vrot.lane.b32.xlu1 %v349_v20, %s1073_s25  ;;  %385 = vrot.lane.b32.xlu0 %v384_v21, %s1074_s14  ;;  %v595_v21 = vld [vmem:[#allocation4 + $0xf0] sm:$0xff] }
 0x153   :  { %498 = vmatpush.msra.mxu1 %v435_v2  ;;  %674 = vmatpush.msra.mxu3 %v595_v21  ;;  %v565_v2 = vld [vmem:[#allocation4] sm:$0xff]  ;;  %v652_v21 = vld [vmem:[#allocation4 + $0x2b8] sm:$0xff] }
 0x154   :  { %380 = vrot.lane.b32.xlu2 %v379_v22, %s1074_s14  ;;  %v418_v23 = vld [vmem:[#allocation2 + $0x10] sm:$0x3f] }
 0x155   :  { %989 = vmatmul.msk.f32.vlgmr.msra.gmra.mxu2 %vm459_vm2, %v418_v23  ;;  %v627_v22 = vld [vmem:[#allocation4 + $0x1f0] sm:$0xff]  ;;  %v593_v23 = vld [vmem:[#allocation4 + $0xe0] sm:$0xff]  ;;  %734 = vmatpush.msrb.mxu1 %v596_v35  ;;  %v572_v35 = vld [vmem:[#allocation4 + $0x38] sm:$0xff] }
 0x156   :  { %694 = vmatpush.msrb.mxu2 %v627_v22  ;;  %675 = vmatpush.msra.mxu3 %v593_v23  ;;  %v641_v22 = vld [vmem:[#allocation4 + $0x260] sm:$0xff]  ;;  %v578_v23 = vld [vmem:[#allocation4 + $0x68] sm:$0xff] }
 0x157   :  { %735 = vmatpush.msrb.mxu1 %v594_v40  ;;  %v570_v40 = vld [vmem:[#allocation4 + $0x28] sm:$0xff] }
 0x15a   :  { %400 = vrot.lane.b32.xlu0 %v399_v11, %s1072_s24  ;;  %368 = vrot.lane.b32.xlu1 %v367_v24, %s1072_s24  ;;  %v625_v11 = vld [vmem:[#allocation4 + $0x1e0] sm:$0xff]  ;;  %v591_v24 = vld [vmem:[#allocation4 + $0xd0] sm:$0xff] }
 0x15b   :  { %695 = vmatpush.msrb.mxu2 %v625_v11  ;;  %676 = vmatpush.msra.mxu3 %v591_v24  ;;  %v618_v11 = vld [vmem:[#allocation4 + $0x1a8] sm:$0xff] }
 0x15c   :  { %395 = vrot.lane.b32.xlu2 %v394_v25, %s1073_s25  ;;  %v623_v25 = vld [vmem:[#allocation4 + $0x1d0] sm:$0xff]  ;;  %v650_v24 = vld [vmem:[#allocation4 + $0x2a8] sm:$0xff] }
 0x15d   :  { %696 = vmatpush.msrb.mxu2 %v623_v25  ;;  %v639_v25 = vld [vmem:[#allocation4 + $0x250] sm:$0xff] }
 0x15f   :  { %697 = vmatpush.msrb.mxu2 %v621_v27  ;;  %v616_v27 = vld [vmem:[#allocation4 + $0x198] sm:$0xff] }
 0x161   :  { %698 = vmatpush.msrb.mxu2 %v619_v30  ;;  %v637_v30 = vld [vmem:[#allocation4 + $0x240] sm:$0xff] }
 0x162   :  { %405 = vrot.lane.b32.xlu1 %v404_v26, %s1072_s24  ;;  %v589_v26 = vld [vmem:[#allocation4 + $0xc0] sm:$0xff] }
 0x163   :  { %677 = vmatpush.msra.mxu3 %v589_v26  ;;  %699 = vmatpush.msrb.mxu2 %v617_v33  ;;  %v576_v26 = vld [vmem:[#allocation4 + $0x58] sm:$0xff]  ;;  %v646_v33 = vld [vmem:[#allocation4 + $0x288] sm:$0xff] }
 0x164   :  { %456 = vrot.lane.b32.xlu2 %v320_v51, %s1072_s24  ;;  %v422_v51 = vld [vmem:[%s1375_s1 + $0x18] sm:$0xff] }
 0x165   :  { %475 = vmatpush.msra.mxu0 %v422_v51  ;;  %678 = vmatpush.msra.mxu3 %v587_v29  ;;  %v573_v51 = vld [vmem:[#allocation4 + $0x40] sm:$0xff]  ;;  %v648_v29 = vld [vmem:[#allocation4 + $0x298] sm:$0xff] }
 0x166   :  { %700 = vmatpush.msrb.mxu2 %v615_v39  ;;  %v633_v39 = vld [vmem:[#allocation4 + $0x220] sm:$0xff] }
 0x167   :  { %476 = vmatpush.msra.mxu0 %v421_v57  ;;  %v571_v57 = vld [vmem:[#allocation4 + $0x30] sm:$0xff] }
 0x168   :  { %701 = vmatpush.msrb.mxu2 %v613_v28  ;;  %v568_v28 = vld [vmem:[#allocation4 + $0x18] sm:$0xff] }
 0x169   :  { %477 = vmatpush.msra.mxu0 %v420_v53 }
 0x16a   :  { %702 = vmatpush.msrb.mxu2 %v611_v45  ;;  %v640_v45 = vld [vmem:[#allocation4 + $0x258] sm:$0xff] }
 0x16b   :  { %478 = vmatpush.msra.mxu0 %v419_v59  ;;  %v601_v59 = vld [vmem:[#allocation4 + $0x120] sm:$0xff] }
 0x16c   :  { %703 = vmatpush.msrb.mxu2 %v609_v48  ;;  %v606_v48 = vld [vmem:[#allocation4 + $0x148] sm:$0xff] }
 0x16d   :  { %714 = vmatpush.msrb.mxu0 %v659_v34  ;;  %v635_v34 = vld [vmem:[#allocation4 + $0x230] sm:$0xff] }
 0x16f   :  { %715 = vmatpush.msrb.mxu0 %v657_v36  ;;  %v612_v36 = vld [vmem:[#allocation4 + $0x178] sm:$0xff] }
 0x171   :  { %716 = vmatpush.msrb.mxu0 %v655_v41  ;;  %v610_v41 = vld [vmem:[#allocation4 + $0x168] sm:$0xff] }
 0x173   :  { %717 = vmatpush.msrb.mxu0 %v653_v63  ;;  %v858_v63 = vld [vmem:[#allocation4 + $0x4f0] sm:$0xff] }
 0x19e   :  { %v339_v32 = vpop.permute.xlu2 %338 }
 0x19f   :  { %342 = vst.msk [vmem:[#allocation2] sm:$0x7] %vm341_vm3, %v339_v32  ;;  %v585_v32 = vld [vmem:[#allocation4 + $0xa0] sm:$0xff] }
 0x1a0   :  { %679 = vmatpush.msra.mxu3 %v585_v32  ;;  %v614_v32 = vld [vmem:[#allocation4 + $0x188] sm:$0xff] }
 0x1a2   :  { %680 = vmatpush.msra.mxu3 %v583_v38  ;;  %v644_v38 = vld [vmem:[#allocation4 + $0x278] sm:$0xff] }
 0x1a4   :  { %681 = vmatpush.msra.mxu3 %v581_v43  ;;  %v631_v43 = vld [vmem:[#allocation4 + $0x210] sm:$0xff] }
 0x1a6   :  { %v357_v42 = vpop.permute.xlu2 %356  ;;  %682 = vmatpush.msra.mxu3 %v579_v44  ;;  %v608_v44 = vld [vmem:[#allocation4 + $0x158] sm:$0xff] }
 0x1a8   :  { %683 = vmatpush.msra.mxu3 %v577_v47  ;;  %v566_v47 = vld [vmem:[#allocation4 + $0x8] sm:$0xff] }
 0x1aa   :  { %684 = vmatpush.msra.mxu3 %v575_v49  ;;  %v638_v49 = vld [vmem:[#allocation4 + $0x248] sm:$0xff] }
 0x1ac   :  { %685 = vmatpush.msra.mxu3 %v573_v51  ;;  %v636_v51 = vld [vmem:[#allocation4 + $0x238] sm:$0xff] }
 0x1ae   :  { %v381_v50 = vpop.permute.xlu2 %380  ;;  %686 = vmatpush.msra.mxu3 %v571_v57  ;;  %v634_v57 = vld [vmem:[#allocation4 + $0x228] sm:$0xff] }
 0x1af   :  { %383 = vst.msk [vmem:[#allocation2 + $0x8] sm:$0x7] %vm341_vm3, %v381_v50  ;;  %v607_v50 = vld [vmem:[#allocation4 + $0x150] sm:$0xff] }
 0x1b0   :  { %704 = vmatpush.msrb.mxu2 %v607_v50  ;;  %687 = vmatpush.msra.mxu3 %v569_v58  ;;  %v604_v50 = vld [vmem:[#allocation4 + $0x138] sm:$0xff] }
 0x1b1   :  { %v632_v58 = vld [vmem:[#allocation4 + $0x218] sm:$0xff] }
 0x1b2   :  { %705 = vmatpush.msrb.mxu2 %v605_v55  ;;  %v602_v55 = vld [vmem:[#allocation4 + $0x128] sm:$0xff] }
 0x1b4   :  { %v362_v61 = vpop.permute.xlu0 %361  ;;  %706 = vmatpush.msrb.mxu2 %v603_v56  ;;  %v799_v56 = vld [vmem:[#allocation4 + $0x318] sm:$0xff] }
 0x1b6   :  { %v396_v6 = vpop.permute.xlu2 %395  ;;  %707 = vmatpush.msrb.mxu2 %v601_v59 }
 0x1b8   :  { %708 = vmatpush.msrb.mxu2 %v599_v62  ;;  %v824_v62 = vld [vmem:[#allocation4 + $0x3e0] sm:$0xff] }
 0x1bc   :  { %v390_v3 = vpop.permute.xlu1 %389  ;;  %v345_v4 = vpop.permute.xlu0 %344 }
 0x1bd   :  { %392 = vst.msk [vmem:[#allocation2 + $0x8] sm:$0x7] %vm353_vm4, %v390_v3  ;;  %v597_v3 = vld [vmem:[#allocation4 + $0x100] sm:$0xff] }
 0x1be   :  { %348 = vst.msk [vmem:[#allocation2] sm:$0x38] %vm347_vm5, %v345_v4  ;;  %v457_v10 = vpop.permute.xlu2 %456  ;;  %v651_v4 = vld [vmem:[#allocation4 + $0x2b0] sm:$0xff]  ;;  %709 = vmatpush.msrb.mxu2 %v597_v3 }
 0x1bf   :  { %360 = vst.msk [vmem:[#allocation2] sm:$0x38] %vm359_vm6, %v357_v42  ;;  %v592_v42 = vld [vmem:[#allocation4 + $0xd8] sm:$0xff]  ;;  %718 = vmatpush.msrb.mxu0 %v651_v4  ;;  %v820_v4 = vld [vmem:[#allocation4 + $0x3c0] sm:$0xff] }
 0x1c0   :  { %736 = vmatpush.msrb.mxu1 %v592_v42  ;;  %v642_v42 = vld [vmem:[#allocation4 + $0x268] sm:$0xff] }
 0x1c2   :  { %737 = vmatpush.msrb.mxu1 %v590_v1  ;;  %v822_v1 = vld [vmem:[#allocation4 + $0x3d0] sm:$0xff] }
 0x1c4   :  { %v351_v5 = vpop.permute.xlu1 %350  ;;  %v386_v52 = vpop.permute.xlu0 %385 }
 0x1c5   :  { %354 = vst.msk [vmem:[#allocation2] sm:$0x7] %vm353_vm4, %v351_v5  ;;  %v588_v5 = vld [vmem:[#allocation4 + $0xb8] sm:$0xff] }
 0x1c6   :  { %365 = vst.msk [vmem:[#allocation2] sm:$0x7] %vm364_vm7, %v362_v61  ;;  %v567_v61 = vld [vmem:[#allocation4 + $0x10] sm:$0xff]  ;;  %738 = vmatpush.msrb.mxu1 %v588_v5 }
 0x1c7   :  { %388 = vst.msk [vmem:[#allocation2 + $0x8] sm:$0x38] %vm347_vm5, %v386_v52  ;;  %688 = vmatpush.msra.mxu3 %v567_v61  ;;  %v628_v52 = vld [vmem:[#allocation4 + $0x1f8] sm:$0xff]  ;;  %v826_v61 = vld [vmem:[#allocation4 + $0x3f0] sm:$0xff] }
 0x1c8   :  { %398 = vst.msk [vmem:[#allocation2 + $0x8] sm:$0x38] %vm359_vm6, %v396_v6  ;;  %v660_v6 = vld [vmem:[#allocation4 + $0x2f8] sm:$0xff]  ;;  %v854_v5 = vld [vmem:[#allocation4 + $0x4d0] sm:$0xff] }
 0x1c9   :  { %689 = vmatpush.msra.mxu3 %v565_v2  ;;  %774 = vmatpush.msra.mxu2 %v660_v6  ;;  %v856_v2 = vld [vmem:[#allocation4 + $0x4e0] sm:$0xff] }
 0x1ca   :  { %v816_v6 = vld [vmem:[#allocation4 + $0x3a0] sm:$0xff] }
 0x1cb   :  { %754 = vmatpush.msrb.mxu3 %v628_v52  ;;  %v818_v52 = vld [vmem:[#allocation4 + $0x3b0] sm:$0xff] }
 0x1cc   :  { %v369_v37 = vpop.permute.xlu1 %368  ;;  %v401_v54 = vpop.permute.xlu0 %400 }
 0x1cd   :  { %372 = vst.msk [vmem:[#allocation2] sm:$0x38] %vm371_vm8, %v369_v37  ;;  %v649_v37 = vld [vmem:[#allocation4 + $0x2a0] sm:$0xff] }
 0x1ce   :  { %403 = vst.msk [vmem:[#allocation2 + $0x8] sm:$0x7] %vm364_vm7, %v401_v54  ;;  %v586_v54 = vld [vmem:[#allocation4 + $0xa8] sm:$0xff]  ;;  %719 = vmatpush.msrb.mxu0 %v649_v37 }
 0x1cf   :  { %739 = vmatpush.msrb.mxu1 %v586_v54 }
 0x1d4   :  { %v406_v7 = vpop.permute.xlu1 %405  ;;  %v416_v8 = vld [vmem:[#allocation2] sm:$0x3f] }
 0x1d5   :  { %408 = vst.msk [vmem:[#allocation2 + $0x8] sm:$0x38] %vm371_vm8, %v406_v7  ;;  %479 = vmatmul.f32.vlgmr.msra.gmra.mxu0 %v416_v8  ;;  %v626_v7 = vld [vmem:[#allocation4 + $0x1e8] sm:$0xff] }
 0x1d6   :  { %v658_v8 = vld [vmem:[#allocation4 + $0x2e8] sm:$0xff]  ;;  %755 = vmatpush.msrb.mxu3 %v626_v7 }
 0x1d7   :  { %775 = vmatpush.msra.mxu2 %v658_v8 }
 0x1d8   :  { %v520_v16 = vpop.f32.mrf.mxu2 }
 0x1dc   :  { %v417_v9 = vld [vmem:[#allocation2 + $0x8] sm:$0x3f] }
 0x1dd   :  { %499 = vmatmul.f32.vlgmr.msra.gmra.mxu1 %v417_v9  ;;  %v647_v9 = vld [vmem:[#allocation4 + $0x290] sm:$0xff] }
 0x1de   :  { %720 = vmatpush.msrb.mxu0 %v647_v9 }
 0x252   :  { %v480_v12 = vpop.f32.mrf.mxu0 }
 0x253   :  { %v481_v13 = vadd.f32 %v480_v12, %v457_v10  ;;  %v584_v10 = vld [vmem:[#allocation4 + $0x98] sm:$0xff] }
 0x254   :  { %v624_v12 = vld [vmem:[#allocation4 + $0x1d8] sm:$0xff]  ;;  %740 = vmatpush.msrb.mxu1 %v584_v10 }
 0x255   :  { %756 = vmatpush.msrb.mxu3 %v624_v12  ;;  %v827_v10 = vld [vmem:[#allocation4 + $0x3f8] sm:$0xff] }
 0x256   :  { %v859_v12 = vld [vmem:[#allocation4 + $0x4f8] sm:$0xff] }
 0x25a   :  { %v500_v14 = vpop.f32.mrf.mxu1 }
 0x25b   :  { %v501_v15 = vadd.f32 %v500_v14, %v481_v13  ;;  %v656_v13 = vld [vmem:[#allocation4 + $0x2d8] sm:$0xff]  ;;  %v645_v14 = vld [vmem:[#allocation4 + $0x280] sm:$0xff] }
 0x25c   :  { %776 = vmatpush.msra.mxu2 %v656_v13  ;;  %721 = vmatpush.msrb.mxu0 %v645_v14  ;;  %v825_v13 = vld [vmem:[#allocation4 + $0x3e8] sm:$0xff] }
 0x25d   :  { %v521_v17 = vadd.f32 %v520_v16, %v501_v15  ;;  %v582_v15 = vld [vmem:[#allocation4 + $0x88] sm:$0xff] }
 0x25e   :  { %v622_v16 = vld [vmem:[#allocation4 + $0x1c8] sm:$0xff]  ;;  %741 = vmatpush.msrb.mxu1 %v582_v15  ;;  %v823_v15 = vld [vmem:[#allocation4 + $0x3d8] sm:$0xff] }
 0x25f   :  { %v1324_v18 = vmax.f32 %v521_v17, 0.0  ;;  %v654_v17 = vld [vmem:[#allocation4 + $0x2c8] sm:$0xff]  ;;  %757 = vmatpush.msrb.mxu3 %v622_v16  ;;  %v855_v16 = vld [vmem:[#allocation4 + $0x4d8] sm:$0xff] }
 0x260   :  { %777 = vmatpush.msra.mxu2 %v654_v17  ;;  %742 = vmatpush.msrb.mxu1 %v580_v19  ;;  %v857_v14 = vld [vmem:[#allocation4 + $0x4e8] sm:$0xff] }
 0x261   :  { %530 = vst [vmem:[#allocation1] sm:$0xff] %v1324_v18  ;;  %v821_v17 = vld [vmem:[#allocation4 + $0x3c8] sm:$0xff] }
 0x262   :  { %528 = vst.msk [vmem:[#allocation3] sm:$0x1] %vm1327_vm9, %v1324_v18  ;;  %778 = vmatpush.msra.mxu2 %v652_v21  ;;  %743 = vmatpush.msrb.mxu1 %v578_v23  ;;  %v817_v19 = vld [vmem:[#allocation4 + $0x3a8] sm:$0xff]  ;;  %v852_v21 = vld [vmem:[#allocation4 + $0x4c0] sm:$0xff] }
 0x263   :  { %v853_v23 = vld [vmem:[#allocation4 + $0x4c8] sm:$0xff] }
 0x264   :  { %779 = vmatpush.msra.mxu2 %v650_v24  ;;  %744 = vmatpush.msrb.mxu1 %v576_v26  ;;  %v850_v24 = vld [vmem:[#allocation4 + $0x4b0] sm:$0xff]  ;;  %v851_v26 = vld [vmem:[#allocation4 + $0x4b8] sm:$0xff] }
 0x266   :  { %780 = vmatpush.msra.mxu2 %v648_v29  ;;  %v848_v29 = vld [vmem:[#allocation4 + $0x4a0] sm:$0xff] }
 0x268   :  { %v532_v20 = vld [vmem:[#allocation1 + $0x1] ss:$9 sm:$0xff]  ;;  %781 = vmatpush.msra.mxu2 %v646_v33 }
 0x269   :  { %533 = vrot.lane.b32.xlu0 %v532_v20, %s1073_s25  ;;  %540 = vst [vmem:[#allocation1] sm:$0xff] %v1324_v18  ;;  %v620_v20 = vld [vmem:[#allocation4 + $0x1b8] sm:$0xff]  ;;  %v846_v33 = vld [vmem:[#allocation4 + $0x490] sm:$0xff] }
 0x26a   :  { %758 = vmatpush.msrb.mxu3 %v620_v20  ;;  %782 = vmatpush.msra.mxu2 %v644_v38  ;;  %v814_v20 = vld [vmem:[#allocation4 + $0x390] sm:$0xff]  ;;  %v844_v38 = vld [vmem:[#allocation4 + $0x480] sm:$0xff] }
 0x26c   :  { %759 = vmatpush.msrb.mxu3 %v618_v11  ;;  %783 = vmatpush.msra.mxu2 %v642_v42  ;;  %v812_v11 = vld [vmem:[#allocation4 + $0x380] sm:$0xff]  ;;  %v842_v42 = vld [vmem:[#allocation4 + $0x470] sm:$0xff] }
 0x26e   :  { %760 = vmatpush.msrb.mxu3 %v616_v27  ;;  %784 = vmatpush.msra.mxu2 %v640_v45  ;;  %v810_v27 = vld [vmem:[#allocation4 + $0x370] sm:$0xff]  ;;  %v840_v45 = vld [vmem:[#allocation4 + $0x460] sm:$0xff] }
 0x270   :  { %v542_v31 = vld [vmem:[#allocation1 + $0x2] ss:$9 sm:$0xff]  ;;  %761 = vmatpush.msrb.mxu3 %v614_v32  ;;  %785 = vmatpush.msra.mxu2 %v638_v49 }
 0x271   :  { %545 = vst [vmem:[#allocation1] sm:$0xff] %v1324_v18  ;;  %v808_v32 = vld [vmem:[#allocation4 + $0x360] sm:$0xff]  ;;  %v838_v49 = vld [vmem:[#allocation4 + $0x450] sm:$0xff] }
 0x272   :  { %544 = vst.msk [vmem:[#allocation3 + $0x1] sm:$0x1] %vm1327_vm9, %v542_v31  ;;  %v574_v31 = vld [vmem:[#allocation4 + $0x48] sm:$0xff]  ;;  %762 = vmatpush.msrb.mxu3 %v612_v36  ;;  %786 = vmatpush.msra.mxu2 %v636_v51  ;;  %v806_v36 = vld [vmem:[#allocation4 + $0x350] sm:$0xff]  ;;  %v839_v51 = vld [vmem:[#allocation4 + $0x458] sm:$0xff] }
 0x273   :  { %745 = vmatpush.msrb.mxu1 %v574_v31  ;;  %v849_v31 = vld [vmem:[#allocation4 + $0x4a8] sm:$0xff] }
 0x274   :  { %763 = vmatpush.msrb.mxu3 %v610_v41  ;;  %787 = vmatpush.msra.mxu2 %v634_v57  ;;  %v804_v41 = vld [vmem:[#allocation4 + $0x340] sm:$0xff] }
 0x275   :  { %746 = vmatpush.msrb.mxu1 %v572_v35  ;;  %v847_v35 = vld [vmem:[#allocation4 + $0x498] sm:$0xff]  ;;  %v836_v57 = vld [vmem:[#allocation4 + $0x440] sm:$0xff] }
 0x276   :  { %764 = vmatpush.msrb.mxu3 %v608_v44  ;;  %788 = vmatpush.msra.mxu2 %v632_v58  ;;  %v802_v44 = vld [vmem:[#allocation4 + $0x330] sm:$0xff]  ;;  %v796_v58 = vld [vmem:[#allocation4 + $0x300] sm:$0xff] }
 0x277   :  { %747 = vmatpush.msrb.mxu1 %v570_v40  ;;  %v845_v40 = vld [vmem:[#allocation4 + $0x488] sm:$0xff] }
 0x278   :  { %v547_v46 = vld [vmem:[#allocation1 + $0x3] ss:$9 sm:$0xff]  ;;  %765 = vmatpush.msrb.mxu3 %v606_v48 }
 0x279   :  { %548 = vrot.lane.b32.xlu1 %v547_v46, %s1073_s25  ;;  %552 = vst [vmem:[#allocation1] sm:$0xff] %v1324_v18  ;;  %v629_v46 = vld [vmem:[#allocation4 + $0x200] sm:$0xff]  ;;  %748 = vmatpush.msrb.mxu1 %v568_v28  ;;  %v843_v28 = vld [vmem:[#allocation4 + $0x478] sm:$0xff] }
 0x27a   :  { %766 = vmatpush.msrb.mxu3 %v604_v50  ;;  %v800_v48 = vld [vmem:[#allocation4 + $0x320] sm:$0xff]  ;;  %v801_v50 = vld [vmem:[#allocation4 + $0x328] sm:$0xff] }
 0x27b   :  { %749 = vmatpush.msrb.mxu1 %v566_v47  ;;  %v841_v47 = vld [vmem:[#allocation4 + $0x468] sm:$0xff] }
 0x27c   :  { %767 = vmatpush.msrb.mxu3 %v602_v55  ;;  %v798_v55 = vld [vmem:[#allocation4 + $0x310] sm:$0xff] }
 0x27d   :  { %887 = vmatpush.msra.mxu1 %v858_v63  ;;  %v830_v63 = vld [vmem:[#allocation4 + $0x410] sm:$0xff] }
 0x27f   :  { %888 = vmatpush.msra.mxu1 %v856_v2  ;;  %v828_v2 = vld [vmem:[#allocation4 + $0x400] sm:$0xff] }
 0x280   :  { %v554_v53 = vld [vmem:[#allocation1 + $0x4] ss:$9 sm:$0xff] }
 0x281   :  { %557 = vst [vmem:[#allocation1] sm:$0xff] %v1324_v18  ;;  %v643_v18 = vld [vmem:[#allocation4 + $0x270] sm:$0xff]  ;;  %889 = vmatpush.msra.mxu1 %v854_v5 }
 0x282   :  { %556 = vst.msk [vmem:[#allocation3 + $0x2] sm:$0x1] %vm1327_vm9, %v554_v53  ;;  %722 = vmatpush.msrb.mxu0 %v643_v18  ;;  %v600_v53 = vld [vmem:[#allocation4 + $0x118] sm:$0xff] }
 0x283   :  { %768 = vmatpush.msrb.mxu3 %v600_v53  ;;  %v819_v18 = vld [vmem:[#allocation4 + $0x3b8] sm:$0xff]  ;;  %890 = vmatpush.msra.mxu1 %v852_v21  ;;  %v837_v53 = vld [vmem:[#allocation4 + $0x448] sm:$0xff] }
 0x284   :  { %723 = vmatpush.msrb.mxu0 %v641_v22  ;;  %v815_v22 = vld [vmem:[#allocation4 + $0x398] sm:$0xff] }
 0x285   :  { %769 = vmatpush.msrb.mxu3 %v598_v0  ;;  %891 = vmatpush.msra.mxu1 %v850_v24  ;;  %v797_v0 = vld [vmem:[#allocation4 + $0x308] sm:$0xff] }
 0x286   :  { %724 = vmatpush.msrb.mxu0 %v639_v25  ;;  %v813_v25 = vld [vmem:[#allocation4 + $0x388] sm:$0xff] }
 0x287   :  { %892 = vmatpush.msra.mxu1 %v848_v29 }
 0x288   :  { %v559_v60 = vld [vmem:[#allocation1 + $0x5] ss:$9 sm:$0xff]  ;;  %725 = vmatpush.msrb.mxu0 %v637_v30 }
 0x289   :  { %560 = vrot.lane.b32.xlu2 %v559_v60, %s1073_s25  ;;  %v630_v60 = vld [vmem:[#allocation4 + $0x208] sm:$0xff]  ;;  %v811_v30 = vld [vmem:[#allocation4 + $0x378] sm:$0xff]  ;;  %893 = vmatpush.msra.mxu1 %v846_v33 }
 0x28a   :  { %726 = vmatpush.msrb.mxu0 %v635_v34  ;;  %789 = vmatpush.msra.mxu2 %v630_v60  ;;  %v809_v34 = vld [vmem:[#allocation4 + $0x368] sm:$0xff]  ;;  %v835_v60 = vld [vmem:[#allocation4 + $0x438] sm:$0xff] }
 0x28b   :  { %894 = vmatpush.msra.mxu1 %v844_v38 }
 0x28c   :  { %727 = vmatpush.msrb.mxu0 %v633_v39  ;;  %v807_v39 = vld [vmem:[#allocation4 + $0x358] sm:$0xff] }
 0x28d   :  { %895 = vmatpush.msra.mxu1 %v842_v42 }
 0x28e   :  { %728 = vmatpush.msrb.mxu0 %v631_v43  ;;  %v805_v43 = vld [vmem:[#allocation4 + $0x348] sm:$0xff] }
 0x28f   :  { %896 = vmatpush.msra.mxu1 %v840_v45 }
 0x290   :  { %729 = vmatpush.msrb.mxu0 %v629_v46  ;;  %v803_v46 = vld [vmem:[#allocation4 + $0x338] sm:$0xff] }
 0x291   :  { %897 = vmatpush.msra.mxu1 %v838_v49 }
 0x292   :  { %867 = vmatpush.msra.mxu0 %v826_v61  ;;  %v832_v61 = vld [vmem:[#allocation4 + $0x420] sm:$0xff] }
 0x293   :  { %898 = vmatpush.msra.mxu1 %v836_v57 }
 0x294   :  { %868 = vmatpush.msra.mxu0 %v824_v62  ;;  %v833_v62 = vld [vmem:[#allocation4 + $0x428] sm:$0xff] }
 0x296   :  { %869 = vmatpush.msra.mxu0 %v822_v1  ;;  %v831_v1 = vld [vmem:[#allocation4 + $0x418] sm:$0xff] }
 0x298   :  { %870 = vmatpush.msra.mxu0 %v820_v4  ;;  %v661_v4 = vld [vmem:[%s1377_s3] ss:$8 sm:$0x3] }
 0x299   :  { %v670_v5 = vperm.slane %v661_v4, 0 }
 0x29a   :  { %871 = vmatpush.msra.mxu0 %v818_v52 }
 0x29c   :  { %872 = vmatpush.msra.mxu0 %v816_v6 }
 0x29e   :  { %873 = vmatpush.msra.mxu0 %v814_v20 }
 0x2a0   :  { %874 = vmatpush.msra.mxu0 %v812_v11 }
 0x2a2   :  { %875 = vmatpush.msra.mxu0 %v810_v27 }
 0x2a4   :  { %876 = vmatpush.msra.mxu0 %v808_v32 }
 0x2a6   :  { %877 = vmatpush.msra.mxu0 %v806_v36 }
 0x2a8   :  { %878 = vmatpush.msra.mxu0 %v804_v41  ;;  %v964_v41 = vld [vmem:[%s1377_s3 + $0x3] ss:$0 sm:$0xff] }
 0x2aa   :  { %879 = vmatpush.msra.mxu0 %v802_v44 }
 0x2ac   :  { %880 = vmatpush.msra.mxu0 %v800_v48 }
 0x2ae   :  { %881 = vmatpush.msra.mxu0 %v798_v55 }
 0x2b0   :  { %882 = vmatpush.msra.mxu0 %v796_v58 }
 0x2db   :  { %v534_v59 = vpop.permute.xlu0 %533 }
 0x2dc   :  { %539 = vst.msk [vmem:[#allocation3] sm:$0x1] %vm1348_vm12, %v534_v59  ;;  %v834_v59 = vld [vmem:[#allocation4 + $0x430] sm:$0xff] }
 0x2dd   :  { %899 = vmatpush.msra.mxu1 %v834_v59 }
 0x2df   :  { %900 = vmatpush.msra.mxu1 %v832_v61 }
 0x2e1   :  { %901 = vmatpush.msra.mxu1 %v830_v63 }
 0x2e3   :  { %v561_v3 = vpop.permute.xlu2 %560  ;;  %902 = vmatpush.msra.mxu1 %v828_v2 }
 0x2e4   :  { %563 = vst.msk [vmem:[#allocation3 + $0x2] sm:$0x1] %vm1348_vm12, %v561_v3  ;;  %v829_v3 = vld [vmem:[#allocation4 + $0x408] sm:$0xff] }
 0x2eb   :  { %v549_v37 = vpop.permute.xlu1 %548 }
 0x2ec   :  { %551 = vst.msk [vmem:[#allocation3 + $0x1] sm:$0x1] %vm1348_vm12, %v549_v37 }
 0x2f3   :  { %v564_v54 = vld [vmem:[#allocation3] sm:$0x7] }
 0x2f4   :  { %v663_v7 = vperm.slane %v564_v54, 0  ;;  %v664_v8 = vperm.slane %v564_v54, 1  ;;  %v665_v9 = vperm.slane %v564_v54, 2  ;;  %v671_v54 = vperm.slane %v661_v4, 1 }
 0x2f6   :  { %690 = vmatmul.f32.vlgmr.msra.gmra.mxu3 %v663_v7  ;;  %710 = vmatmul.f32.vlgmr.msrb.gmra.mxu2 %v664_v8 }
 0x2f7   :  { %730 = vmatmul.f32.vlgmr.msrb.gmra.mxu0 %v665_v9  ;;  %750 = vmatmul.f32.vlgmr.msrb.gmra.mxu1 %v663_v7 }
 0x2f8   :  { %907 = vmatpush.msra.mxu3 %v827_v10  ;;  %927 = vmatpush.msrb.mxu2 %v859_v12 }
 0x2fa   :  { %908 = vmatpush.msra.mxu3 %v825_v13  ;;  %928 = vmatpush.msrb.mxu2 %v857_v14 }
 0x2fc   :  { %909 = vmatpush.msra.mxu3 %v823_v15  ;;  %929 = vmatpush.msrb.mxu2 %v855_v16 }
 0x2fe   :  { %770 = vmatmul.f32.vlgmr.msrb.gmra.mxu3 %v664_v8  ;;  %790 = vmatmul.f32.vlgmr.msra.gmra.mxu2 %v665_v9 }
 0x2ff   :  { %910 = vmatpush.msra.mxu3 %v821_v17  ;;  %930 = vmatpush.msrb.mxu2 %v853_v23 }
 0x301   :  { %911 = vmatpush.msra.mxu3 %v819_v18  ;;  %931 = vmatpush.msrb.mxu2 %v851_v26 }
 0x303   :  { %912 = vmatpush.msra.mxu3 %v817_v19  ;;  %932 = vmatpush.msrb.mxu2 %v849_v31  ;;  %v990_v19 = vld [vmem:[%s1377_s3 + $0x1] ss:$8 sm:$0x3] }
 0x304   :  { %v863_v20 = vperm.slane %v990_v19, 0  ;;  %v864_v24 = vperm.slane %v990_v19, 1 }
 0x305   :  { %913 = vmatpush.msra.mxu3 %v815_v22  ;;  %933 = vmatpush.msrb.mxu2 %v847_v35 }
 0x307   :  { %914 = vmatpush.msra.mxu3 %v813_v25  ;;  %934 = vmatpush.msrb.mxu2 %v845_v40 }
 0x309   :  { %915 = vmatpush.msra.mxu3 %v811_v30  ;;  %935 = vmatpush.msrb.mxu2 %v843_v28  ;;  %v991_v30 = vld [vmem:[%s1377_s3 + $0x2] ss:$8 sm:$0x3] }
 0x30a   :  { %v952_v31 = vperm.slane %v991_v30, 0  ;;  %v953_v33 = vperm.slane %v991_v30, 1 }
 0x30b   :  { %916 = vmatpush.msra.mxu3 %v809_v34  ;;  %936 = vmatpush.msrb.mxu2 %v841_v47 }
 0x30d   :  { %917 = vmatpush.msra.mxu3 %v807_v39  ;;  %937 = vmatpush.msrb.mxu2 %v839_v51 }
 0x30f   :  { %918 = vmatpush.msra.mxu3 %v805_v43  ;;  %938 = vmatpush.msrb.mxu2 %v837_v53 }
 0x311   :  { %919 = vmatpush.msra.mxu3 %v803_v46  ;;  %939 = vmatpush.msrb.mxu2 %v835_v60 }
 0x313   :  { %920 = vmatpush.msra.mxu3 %v801_v50  ;;  %940 = vmatpush.msrb.mxu2 %v833_v62 }
 0x315   :  { %921 = vmatpush.msra.mxu3 %v799_v56  ;;  %941 = vmatpush.msrb.mxu2 %v831_v1 }
 0x317   :  { %922 = vmatpush.msra.mxu3 %v797_v0  ;;  %942 = vmatpush.msrb.mxu2 %v829_v3 }
 0x374   :  { %v731_v8 = vpop.f32.mrf.mxu0  ;;  %v751_v9 = vpop.f32.mrf.mxu1 }
 0x375   :  { %v752_v12 = vadd.f32 %v751_v9, %v671_v54 }
 0x379   :  { %v691_v52 = vpop.f32.mrf.mxu3  ;;  %v711_v6 = vpop.f32.mrf.mxu2 }
 0x37a   :  { %v692_v37 = vadd.f32 %v691_v52, %v670_v5 }
 0x37c   :  { %v712_v7 = vadd.f32 %v711_v6, %v692_v37 }
 0x37e   :  { %v732_v10 = vadd.f32 %v731_v8, %v712_v7 }
 0x380   :  { %1009 = vtanh.f32 %v732_v10 }
 0x381   :  { %v771_v13 = vpop.f32.mrf.mxu3  ;;  %v791_v15 = vpop.f32.mrf.mxu2 }
 0x382   :  { %v772_v14 = vadd.f32 %v771_v13, %v752_v12 }
 0x384   :  { %v792_v16 = vadd.f32 %v791_v15, %v772_v14 }
 0x386   :  { %v1010_v17 = vpop.eup %1009  ;;  %1011 = vtanh.f32 %v792_v16 }
 0x387   :  { %883 = vmatmul.f32.vlgmr.msra.gmra.mxu0 %v1010_v17  ;;  %923 = vmatmul.f32.vlgmr.msra.gmra.mxu3 %v1010_v17 }
 0x38c   :  { %v1012_v18 = vpop.eup %1011 }
 0x38d   :  { %903 = vmatmul.f32.vlgmr.msra.gmra.mxu1 %v1012_v18  ;;  %943 = vmatmul.f32.vlgmr.msrb.gmra.mxu2 %v1012_v18 }
 0x404   :  { %v884_v21 = vpop.f32.mrf.mxu0 }
 0x405   :  { %v885_v22 = vadd.f32 %v884_v21, %v863_v20 }
 0x40a   :  { %v904_v23 = vpop.f32.mrf.mxu1  ;;  %v924_v25 = vpop.f32.mrf.mxu3 }
 0x40b   :  { %v905_v11 = vadd.f32 %v904_v23, %v885_v22  ;;  %v925_v26 = vadd.f32 %v924_v25, %v864_v24 }
 0x40d   :  { %1013 = vtanh.f32 %v905_v11 }
 0x410   :  { %v944_v27 = vpop.f32.mrf.mxu2 }
 0x411   :  { %v945_v29 = vadd.f32 %v944_v27, %v925_v26 }
 0x413   :  { %1015 = vtanh.f32 %v945_v29  ;;  %v1014_v32 = vpop.eup %1013 }
 0x414   :  { %v956_v34 = vmul.f32 %v1014_v32, %v952_v31 }
 0x416   :  { %v959_v38 = vsel %vm958_vm13, %v956_v34, 0.0 }
 0x419   :  { %v1016_v35 = vpop.eup %1015 }
 0x41a   :  { %v957_v36 = vmul.f32 %v1016_v35, %v953_v33 }
 0x41c   :  { %v960_v39 = vsel %vm958_vm13, %v957_v36, 0.0 }
 0x41d   :  { %v961_v40 = vadd.f32 %v960_v39, %v959_v38 }
 0x41f   :  { %962 = vadd.xlane.f32.xlu0 %v961_v40 }
 0x492   :  { %v963_v42 = vpop.xlane.xlu0 %962 }
 0x493   :  { %v965_v43 = vadd.f32 %v964_v41, %v963_v42 }
 0x495   :  { %967 = vrot.lane.b32.xlu1 %v965_v43, %s1074_s14 }
 0x507   :  { %v968_v28 = vpop.permute.xlu1 %967 }
 0x508   :  { %971 = vst.msk [vmem:[#allocation7] sm:$0x1] %vm970_vm14, %v968_v28 }
 0x509   :  { %982 = dma.vmem_to_hbm [thread:$0]  %s978_s7, 16, %s980_s10, [#allocation6]  }
 0x50a   :  { %1067 = dma.done.wait [#allocation6], 16  }
 0x50b   :  { %1068 = vsyncadd [#allocation6], 4294967280 }
 0x50c   :  { %987 = vsyncpa [#allocation5], 1 }
 0x50d   :  { %988 = vsyncpa [#allocation6], 1 }

</bundles_post_ra>
